<compile_context>
chip_gen: v7x
topology: tpu7x:2x2x1
jax: 0.10.0
libtpu: 0.0.40
codegen_flags: <defaults>
</compile_context>

<pallas_src>
import jax
import jax.numpy as jnp
from jax.experimental import pallas as pl
from jax.experimental.pallas import tpu as pltpu


def _round_up(x, m):
    return ((x + m - 1) // m) * m


# ------------------------------ fused kernel ---------------------------------

def _make_fused_lstm_kernel(num_layers, seq, batch_p, H, Hp, Gp, compact):
    """Builds the fused (LSTM stack + MLP head) kernel for static shapes."""

    def kernel(*refs):
        it = iter(refs)
        # ---- inputs ----
        x_ref = next(it)                                    # (seq*batch_p, in_dp) bf16
        lstm_w = [(next(it), next(it), next(it))            # (w_ih, w_hh, b) per layer
                  for _ in range(num_layers)]
        w1_ref = next(it); b1_ref = next(it)                # (Hp, midp) bf16, (1, midp) f32
        w2_ref = next(it); b2_ref = next(it)                # (midp, outp) bf16, (1, outp) f32
        h0_ref = next(it); c0_ref = next(it)                # (L, batch_p, Hp) f32
        # ---- outputs ----
        logits_ref = next(it)                               # (batch_p, outp) f32
        hn_ref = next(it); cn_ref = next(it)                # (L, batch_p, Hp) f32 (aliased)
        # ---- scratch ----
        proj_sc = next(it)                                  # (seq*batch_p, Gp) f32

        # Hoisted layer-0 input projection: one big bf16 matmul (f32 accumulate)
        # for the whole sequence, with both PyTorch biases fused in.
        w_ih0, _, b0 = lstm_w[0]
        proj_sc[...] = (
            jnp.dot(x_ref[...], w_ih0[...], preferred_element_type=jnp.float32)
            + b0[...])

        if compact:
            # All four gates share one 128-lane block (PyTorch order i,f,g,o,
            # each H lanes wide).  Hoisted once (no per-iter broadcasts).
            lane = jax.lax.broadcasted_iota(jnp.int32, (batch_p, Gp), 1)
            g_tanh_mask = (lane >= 2 * H) & (lane < 3 * H)

        def cell_update(gates, c):
            if compact:
                # One activation pass over a single vreg, then XLU rotates to
                # bring each gate onto lanes [0, H).  Lanes >= H become bounded
                # garbage; all consumers have zero weight rows there.
                act = jnp.where(g_tanh_mask, jnp.tanh(gates), jax.nn.sigmoid(gates))
                i_g = act                                           # lanes [0,H) = i
                f_g = pltpu.roll(act, shift=Gp - 1 * H, axis=1)     # lanes [0,H) = f
                g_g = pltpu.roll(act, shift=Gp - 2 * H, axis=1)     # lanes [0,H) = g
                o_g = pltpu.roll(act, shift=Gp - 3 * H, axis=1)     # lanes [0,H) = o
            else:
                # Per-gate 128-aligned Hp-wide blocks -> free lane slicing.
                i_g = jax.nn.sigmoid(gates[:, 0 * Hp:1 * Hp])
                f_g = jax.nn.sigmoid(gates[:, 1 * Hp:2 * Hp])
                g_g = jnp.tanh(gates[:, 2 * Hp:3 * Hp])
                o_g = jax.nn.sigmoid(gates[:, 3 * Hp:4 * Hp])
            c_new = f_g * c + i_g * g_g
            h_new = o_g * jnp.tanh(c_new)
            return h_new, c_new

        h = [h0_ref[l] for l in range(num_layers)]           # f32 (cell math / outputs)
        hb = [v.astype(jnp.bfloat16) for v in h]              # bf16 (MXU operands)
        c = [c0_ref[l] for l in range(num_layers)]

        # Wavefront over time: at wavefront step t, layer l runs its own time
        # step s = t - l; its input is layer (l-1)'s hidden from wavefront step
        # t-1, so the per-layer chains are independent within a step.
        # TODO(synk): switch to lax.fori_loop(..., unroll=k) once seq grows
        # beyond ~16 to bound vreg live ranges / compile time, and chunk
        # proj_sc over time blocks for long sequences (v7x 64 MiB VMEM).
        # TODO(synk): keep W_hh resident on the MXU across the time loop via
        # pltpu.matmul_push_rhs/acc_lhs/pop to stop per-step RHS re-staging
        # (bf16 operands already halve it).
        for t in range(seq + num_layers - 1):
            hb_prev = list(hb)                 # snapshot: layer l reads h_{l-1} of step t-1
            for l in range(num_layers):
                s = t - l
                if s < 0 or s >= seq:
                    continue
                w_ih, w_hh, b = lstm_w[l]
                if l == 0:
                    x_part = proj_sc[s * batch_p:(s + 1) * batch_p, :]
                else:
                    x_part = (jnp.dot(hb_prev[l - 1], w_ih[...],
                                      preferred_element_type=jnp.float32)
                              + b[...])
                gates = x_part + jnp.dot(hb_prev[l], w_hh[...],
                                         preferred_element_type=jnp.float32)
                h[l], c[l] = cell_update(gates, c[l])
                hb[l] = h[l].astype(jnp.bfloat16)

        # Final states written exactly once per layer (buffers aliased to h0/c0).
        for l in range(num_layers):
            hn_ref[l] = h[l]
            cn_ref[l] = c[l]

        # Fused MLP head on the top layer's last-timestep hidden state
        # (linear1 -> linear2, no activation in between -- matches the module).
        hid = (jnp.dot(hb[-1], w1_ref[...], preferred_element_type=jnp.float32)
               + b1_ref[...])
        logits_ref[...] = (
            jnp.dot(hid.astype(jnp.bfloat16), w2_ref[...],
                    preferred_element_type=jnp.float32)
            + b2_ref[...])

    return kernel


# ------------------------------ parameter packing ----------------------------

def _pack_gates(w, H, G, Gp):
    """Repack gate blocks [i|f|g|o] of width H into blocks of width G inside a
    Gp-wide lane-aligned layout; everything else is zero-padded."""
    lead = w.shape[0]
    w4 = w.reshape(lead, 4, H)
    w4 = jnp.pad(w4, ((0, 0), (0, 0), (0, G - H)))
    w_p = w4.reshape(lead, 4 * G)
    return jnp.pad(w_p, ((0, 0), (0, Gp - 4 * G)))


class LSTMParams:
    """Deterministic parameters mirroring the PyTorch module, pre-packed for the kernel."""

    def __init__(self, key, input_dim, hidden_dim, output_dim, num_layers=2):
        self.input_dim = input_dim
        self.hidden_dim = hidden_dim
        self.output_dim = output_dim
        self.num_layers = num_layers

        H = hidden_dim
        Hp = _round_up(H, 128)
        # Compact packing: all four gates fit one 128-lane block (H <= 32).
        self.compact = (4 * H <= 128)
        G = H if self.compact else Hp
        Gp = 128 if self.compact else 4 * Hp
        midp = _round_up(max(H // 2, 1), 128)
        outp = _round_up(output_dim, 128)
        in_dp = _round_up(input_dim, 8)          # sublane-align layer-0 K dim
        self.Hp, self.Gp, self.midp, self.outp, self.in_dp = Hp, Gp, midp, outp, in_dp

        k_lstm = 1.0 / jnp.sqrt(jnp.float32(H))
        self.layers = []
        for l in range(num_layers):
            in_d = input_dim if l == 0 else H
            in_d_pad = in_dp if l == 0 else Hp
            key, k1, k2, k3, k4 = jax.random.split(key, 5)
            w_ih = jax.random.uniform(k1, (4 * H, in_d), jnp.float32, -k_lstm, k_lstm)
            w_hh = jax.random.uniform(k2, (4 * H, H), jnp.float32, -k_lstm, k_lstm)
            b_ih = jax.random.uniform(k3, (4 * H,), jnp.float32, -k_lstm, k_lstm)
            b_hh = jax.random.uniform(k4, (4 * H,), jnp.float32, -k_lstm, k_lstm)
            # transpose, zero-pad rows to the padded feature dim, lane-align gate
            # cols, fuse the two biases, and cast matmul operands to bf16.
            w_ih_t = jnp.pad(w_ih.T, ((0, in_d_pad - in_d), (0, 0)))   # (in_d_pad, 4H)
            w_hh_t = jnp.pad(w_hh.T, ((0, Hp - H), (0, 0)))            # (Hp, 4H)
            self.layers.append(dict(
                w_ih=_pack_gates(w_ih_t, H, G, Gp).astype(jnp.bfloat16),   # (in_d_pad, Gp)
                w_hh=_pack_gates(w_hh_t, H, G, Gp).astype(jnp.bfloat16),   # (Hp, Gp)
                b=_pack_gates((b_ih + b_hh).reshape(1, 4 * H), H, G, Gp),  # (1, Gp) f32
            ))

        key, k1, k2, k3, k4 = jax.random.split(key, 5)
        k_l1 = 1.0 / jnp.sqrt(jnp.float32(H))
        k_l2 = 1.0 / jnp.sqrt(jnp.float32(max(H // 2, 1)))
        w1 = jax.random.uniform(k1, (H // 2, H), jnp.float32, -k_l1, k_l1)
        b1 = jax.random.uniform(k2, (H // 2,), jnp.float32, -k_l1, k_l1)
        w2 = jax.random.uniform(k3, (output_dim, H // 2), jnp.float32, -k_l2, k_l2)
        b2 = jax.random.uniform(k4, (output_dim,), jnp.float32, -k_l2, k_l2)
        self.w1_t = jnp.pad(w1.T, ((0, Hp - H), (0, midp - H // 2))
                            ).astype(jnp.bfloat16)                           # (Hp, midp)
        self.b1 = jnp.pad(b1.reshape(1, -1), ((0, 0), (0, midp - H // 2)))   # (1, midp)
        self.w2_t = jnp.pad(w2.T, ((0, midp - H // 2), (0, outp - output_dim))
                            ).astype(jnp.bfloat16)                           # (midp, outp)
        self.b2 = jnp.pad(b2.reshape(1, -1), ((0, 0), (0, outp - output_dim)))  # (1, outp)


# --------------------------------- forward -----------------------------------

def lstm_forward(params, x, hidden=None):
    """Forward pass matching LSTM.forward with only_last=True.

    x: (batch, input_dim, seq)  -- PyTorch (N, C, L)
    returns (logits (batch, output_dim), (h_n, c_n)) with
            h_n, c_n of shape (num_layers, batch, hidden_dim).
    """
    # TODO(synk): only the only_last=True branch is implemented (the
    # AdaptiveAvgPool1d path of only_last=False is omitted, matching the default).
    batch, in_dim, seq = x.shape
    H, Hp, Gp = params.hidden_dim, params.Hp, params.Gp
    L = params.num_layers
    batch_p = _round_up(batch, 8)

    # input.permute(2, 0, 1) -> (seq, batch, feat); pad batch to a sublane
    # multiple and the feature dim to in_dp, flatten (seq, batch) so the hoisted
    # layer-0 projection is one 2-D matmul with tile-aligned per-step rows.
    x_seq = jnp.transpose(x, (2, 0, 1)).astype(jnp.float32)
    x2d = jnp.pad(x_seq, ((0, 0), (0, batch_p - batch), (0, params.in_dp - in_dim))
                  ).reshape(seq * batch_p, params.in_dp).astype(jnp.bfloat16)

    if hidden is None:
        h0 = jnp.zeros((L, batch_p, Hp), jnp.float32)
        c0 = jnp.zeros((L, batch_p, Hp), jnp.float32)
    else:
        h0_in, c0_in = hidden
        pad = ((0, 0), (0, batch_p - batch), (0, Hp - H))
        h0 = jnp.pad(h0_in.astype(jnp.float32), pad)
        c0 = jnp.pad(c0_in.astype(jnp.float32), pad)

    kernel = _make_fused_lstm_kernel(L, seq, batch_p, H, Hp, Gp, params.compact)
    out_shapes = (
        jax.ShapeDtypeStruct((batch_p, params.outp), jnp.float32),   # logits (padded)
        jax.ShapeDtypeStruct((L, batch_p, Hp), jnp.float32),         # h_n (padded)
        jax.ShapeDtypeStruct((L, batch_p, Hp), jnp.float32),         # c_n (padded)
    )
    args = [x2d]
    for lyr in params.layers:
        args += [lyr["w_ih"], lyr["w_hh"], lyr["b"]]
    args += [params.w1_t, params.b1, params.w2_t, params.b2, h0, c0]
    h0_idx = len(args) - 2    # alias h0 -> h_n and c0 -> c_n (write-once states)

    # TODO(synk): for batch_p >= 16 add a "parallel" grid axis over batch tiles
    # to use v7x's second TensorCore; gridless is fine for tiny batches.
    logits_p, hn_p, cn_p = pl.pallas_call(
        kernel,
        out_shape=out_shapes,
        scratch_shapes=[
            pltpu.VMEM((seq * batch_p, Gp), jnp.float32),   # hoisted layer-0 gate proj
        ],
        input_output_aliases={h0_idx: 1, h0_idx + 1: 2},
        compiler_params=pltpu.CompilerParams(vmem_limit_bytes=64 * 1024 * 1024),
    )(*args)

    # lstm_out.squeeze()[-1] -> last timestep of the top layer (done in-kernel).
    # TODO(synk): for batch == 1 PyTorch's squeeze() also drops the batch dim, so
    # [-1] would index hidden features instead; that edge case is not replicated.
    logits = logits_p[:batch, :params.output_dim]
    h_n = hn_p[:, :batch, :H]
    c_n = cn_p[:, :batch, :H]
    return logits, (h_n, c_n)


if __name__ == "__main__":
    # small shapes consistent with the module's forward
    batch, input_dim, seq = 2, 4, 8
    hidden_dim, output_dim, num_layers = 32, 5, 2

    key = jax.random.PRNGKey(0)
    key, k_params, k_x = jax.random.split(key, 3)

    params = LSTMParams(k_params, input_dim, hidden_dim, output_dim, num_layers)
    x = jax.random.normal(k_x, (batch, input_dim, seq), jnp.float32)

    logits, (h_n, c_n) = lstm_forward(params, x)
    jax.block_until_ready((logits, h_n, c_n))

    assert logits.shape == (batch, output_dim)
    assert h_n.shape == (num_layers, batch, hidden_dim)
    assert c_n.shape == (num_layers, batch, hidden_dim)
    print("KERNEL_OK")
</pallas_src>

<mosaic_0001>
module attributes {stable_mosaic.version = 11 : i64} {
  func.func @kernel(%arg0: memref<64x8xbf16, #tpu.memory_space<vmem>>, %arg1: memref<8x128xbf16, #tpu.memory_space<vmem>>, %arg2: memref<128x128xbf16, #tpu.memory_space<vmem>>, %arg3: memref<1x128xf32, #tpu.memory_space<vmem>>, %arg4: memref<128x128xbf16, #tpu.memory_space<vmem>>, %arg5: memref<128x128xbf16, #tpu.memory_space<vmem>>, %arg6: memref<1x128xf32, #tpu.memory_space<vmem>>, %arg7: memref<128x128xbf16, #tpu.memory_space<vmem>>, %arg8: memref<1x128xf32, #tpu.memory_space<vmem>>, %arg9: memref<128x128xbf16, #tpu.memory_space<vmem>>, %arg10: memref<1x128xf32, #tpu.memory_space<vmem>>, %arg11: memref<2x8x128xf32, #tpu.memory_space<vmem>>, %arg12: memref<2x8x128xf32, #tpu.memory_space<vmem>>, %arg13: memref<8x128xf32, #tpu.memory_space<vmem>>, %arg14: memref<2x8x128xf32, #tpu.memory_space<vmem>>, %arg15: memref<2x8x128xf32, #tpu.memory_space<vmem>>, %arg16: memref<64x128xf32, #tpu.memory_space<vmem>>) attributes {dimension_semantics = [], scalar_prefetch = 0 : i64, scratch_operands = 1 : i64, tpu.core_type = #tpu.core_type<tc>} {
    %c0 = arith.constant 0 : index
    %c0_0 = arith.constant 0 : index
    %0 = vector.load %arg0[%c0, %c0_0] : memref<64x8xbf16, #tpu.memory_space<vmem>>, vector<64x8xbf16>
    %c0_1 = arith.constant 0 : index
    %c0_2 = arith.constant 0 : index
    %1 = vector.load %arg1[%c0_1, %c0_2] : memref<8x128xbf16, #tpu.memory_space<vmem>>, vector<8x128xbf16>
    %cst = arith.constant dense<0.000000e+00> : vector<64x128xf32>
    %2 = tpu.matmul %0, %1, %cst {dimension_numbers = #tpu.dot_dimension_numbers<[1], [0], [0], [1], [0, 0, 1, 1], [], []>} : vector<64x8xbf16>, vector<8x128xbf16>, vector<64x128xf32> -> vector<64x128xf32>
    %c0_3 = arith.constant 0 : index
    %c0_4 = arith.constant 0 : index
    %3 = vector.load %arg3[%c0_3, %c0_4] : memref<1x128xf32, #tpu.memory_space<vmem>>, vector<1x128xf32>
    %4 = vector.broadcast %3 : vector<1x128xf32> to vector<64x128xf32>
    %5 = arith.addf %2, %4 : vector<64x128xf32>
    %c0_5 = arith.constant 0 : index
    %c0_6 = arith.constant 0 : index
    %6 = vector.load %arg16[%c0_5, %c0_6] : memref<64x128xf32, #tpu.memory_space<vmem>>, vector<64x128xf32>
    tpu.vector_store %arg16[%c0_5, %c0_6], %5 {strides = array<i32>} : memref<64x128xf32, #tpu.memory_space<vmem>>, vector<64x128xf32>,
    %7 = tpu.iota {dimensions = array<i32: 1>} : vector<8x128xi32>
    %c64_i32 = arith.constant 64 : i32
    %8 = vector.broadcast %c64_i32 : i32 to vector<8x128xi32>
    %9 = arith.cmpi sge, %7, %8 : vector<8x128xi32>
    %c96_i32 = arith.constant 96 : i32
    %10 = vector.broadcast %c96_i32 : i32 to vector<8x128xi32>
    %11 = arith.cmpi slt, %7, %10 : vector<8x128xi32>
    %12 = arith.andi %9, %11 : vector<8x128xi1>
    %c0_7 = arith.constant 0 : index
    %c0_8 = arith.constant 0 : index
    %c0_9 = arith.constant 0 : index
    %13 = vector.load %arg11[%c0_7, %c0_8, %c0_9] : memref<2x8x128xf32, #tpu.memory_space<vmem>>, vector<1x8x128xf32>
    %14 = vector.shape_cast %13 : vector<1x8x128xf32> to vector<8x128xf32>
    %c1 = arith.constant 1 : index
    %c0_10 = arith.constant 0 : index
    %c0_11 = arith.constant 0 : index
    %15 = vector.load %arg11[%c1, %c0_10, %c0_11] : memref<2x8x128xf32, #tpu.memory_space<vmem>>, vector<1x8x128xf32>
    %16 = vector.shape_cast %15 : vector<1x8x128xf32> to vector<8x128xf32>
    %17 = arith.truncf %14 : vector<8x128xf32> to vector<8x128xbf16>
    %18 = arith.truncf %16 : vector<8x128xf32> to vector<8x128xbf16>
    %c0_12 = arith.constant 0 : index
    %c0_13 = arith.constant 0 : index
    %c0_14 = arith.constant 0 : index
    %19 = vector.load %arg12[%c0_12, %c0_13, %c0_14] : memref<2x8x128xf32, #tpu.memory_space<vmem>>, vector<1x8x128xf32>
    %20 = vector.shape_cast %19 : vector<1x8x128xf32> to vector<8x128xf32>
    %c1_15 = arith.constant 1 : index
    %c0_16 = arith.constant 0 : index
    %c0_17 = arith.constant 0 : index
    %21 = vector.load %arg12[%c1_15, %c0_16, %c0_17] : memref<2x8x128xf32, #tpu.memory_space<vmem>>, vector<1x8x128xf32>
    %22 = vector.shape_cast %21 : vector<1x8x128xf32> to vector<8x128xf32>
    %c0_18 = arith.constant 0 : index
    %c0_19 = arith.constant 0 : index
    %23 = vector.load %arg16[%c0_18, %c0_19] : memref<64x128xf32, #tpu.memory_space<vmem>>, vector<8x128xf32>
    %c0_20 = arith.constant 0 : index
    %c0_21 = arith.constant 0 : index
    %24 = vector.load %arg2[%c0_20, %c0_21] : memref<128x128xbf16, #tpu.memory_space<vmem>>, vector<128x128xbf16>
    %cst_22 = arith.constant dense<0.000000e+00> : vector<8x128xf32>
    %25 = tpu.matmul %17, %24, %cst_22 {dimension_numbers = #tpu.dot_dimension_numbers<[1], [0], [0], [1], [0, 0, 1, 1], [], []>} : vector<8x128xbf16>, vector<128x128xbf16>, vector<8x128xf32> -> vector<8x128xf32>
    %26 = arith.addf %23, %25 : vector<8x128xf32>
    %27 = math.tanh %26 : vector<8x128xf32>
    %28 = arith.negf %26 : vector<8x128xf32>
    %29 = math.exp %28 : vector<8x128xf32>
    %cst_23 = arith.constant 1.000000e+00 : f32
    %30 = vector.broadcast %cst_23 : f32 to vector<8x128xf32>
    %31 = arith.addf %30, %29 : vector<8x128xf32>
    %32 = arith.divf %30, %31 : vector<8x128xf32>
    %33 = arith.select %12, %27, %32 : vector<8x128xi1>, vector<8x128xf32>
    %c96_i32_24 = arith.constant 96 : i32
    %34 = tpu.dynamic_rotate %33 by %c96_i32_24 dim 1 : vector<8x128xf32>, i32 -> vector<8x128xf32>
    %c64_i32_25 = arith.constant 64 : i32
    %35 = tpu.dynamic_rotate %33 by %c64_i32_25 dim 1 : vector<8x128xf32>, i32 -> vector<8x128xf32>
    %c32_i32 = arith.constant 32 : i32
    %36 = tpu.dynamic_rotate %33 by %c32_i32 dim 1 : vector<8x128xf32>, i32 -> vector<8x128xf32>
    %37 = arith.mulf %34, %20 : vector<8x128xf32>
    %38 = arith.mulf %33, %35 : vector<8x128xf32>
    %39 = arith.addf %37, %38 : vector<8x128xf32>
    %40 = math.tanh %39 : vector<8x128xf32>
    %41 = arith.mulf %36, %40 : vector<8x128xf32>
    %42 = arith.truncf %41 : vector<8x128xf32> to vector<8x128xbf16>
    %c8 = arith.constant 8 : index
    %c0_26 = arith.constant 0 : index
    %43 = vector.load %arg16[%c8, %c0_26] : memref<64x128xf32, #tpu.memory_space<vmem>>, vector<8x128xf32>
    %c0_27 = arith.constant 0 : index
    %c0_28 = arith.constant 0 : index
    %44 = vector.load %arg2[%c0_27, %c0_28] : memref<128x128xbf16, #tpu.memory_space<vmem>>, vector<128x128xbf16>
    %cst_29 = arith.constant dense<0.000000e+00> : vector<8x128xf32>
    %45 = tpu.matmul %42, %44, %cst_29 {dimension_numbers = #tpu.dot_dimension_numbers<[1], [0], [0], [1], [0, 0, 1, 1], [], []>} : vector<8x128xbf16>, vector<128x128xbf16>, vector<8x128xf32> -> vector<8x128xf32>
    %46 = arith.addf %43, %45 : vector<8x128xf32>
    %47 = math.tanh %46 : vector<8x128xf32>
    %48 = arith.negf %46 : vector<8x128xf32>
    %49 = math.exp %48 : vector<8x128xf32>
    %cst_30 = arith.constant 1.000000e+00 : f32
    %50 = vector.broadcast %cst_30 : f32 to vector<8x128xf32>
    %51 = arith.addf %50, %49 : vector<8x128xf32>
    %52 = arith.divf %50, %51 : vector<8x128xf32>
    %53 = arith.select %12, %47, %52 : vector<8x128xi1>, vector<8x128xf32>
    %c96_i32_31 = arith.constant 96 : i32
    %54 = tpu.dynamic_rotate %53 by %c96_i32_31 dim 1 : vector<8x128xf32>, i32 -> vector<8x128xf32>
    %c64_i32_32 = arith.constant 64 : i32
    %55 = tpu.dynamic_rotate %53 by %c64_i32_32 dim 1 : vector<8x128xf32>, i32 -> vector<8x128xf32>
    %c32_i32_33 = arith.constant 32 : i32
    %56 = tpu.dynamic_rotate %53 by %c32_i32_33 dim 1 : vector<8x128xf32>, i32 -> vector<8x128xf32>
    %57 = arith.mulf %54, %39 : vector<8x128xf32>
    %58 = arith.mulf %53, %55 : vector<8x128xf32>
    %59 = arith.addf %57, %58 : vector<8x128xf32>
    %60 = math.tanh %59 : vector<8x128xf32>
    %61 = arith.mulf %56, %60 : vector<8x128xf32>
    %62 = arith.truncf %61 : vector<8x128xf32> to vector<8x128xbf16>
    %c0_34 = arith.constant 0 : index
    %c0_35 = arith.constant 0 : index
    %63 = vector.load %arg4[%c0_34, %c0_35] : memref<128x128xbf16, #tpu.memory_space<vmem>>, vector<128x128xbf16>
    %cst_36 = arith.constant dense<0.000000e+00> : vector<8x128xf32>
    %64 = tpu.matmul %42, %63, %cst_36 {dimension_numbers = #tpu.dot_dimension_numbers<[1], [0], [0], [1], [0, 0, 1, 1], [], []>} : vector<8x128xbf16>, vector<128x128xbf16>, vector<8x128xf32> -> vector<8x128xf32>
    %c0_37 = arith.constant 0 : index
    %c0_38 = arith.constant 0 : index
    %65 = vector.load %arg6[%c0_37, %c0_38] : memref<1x128xf32, #tpu.memory_space<vmem>>, vector<1x128xf32>
    %66 = vector.broadcast %65 : vector<1x128xf32> to vector<8x128xf32>
    %67 = arith.addf %64, %66 : vector<8x128xf32>
    %c0_39 = arith.constant 0 : index
    %c0_40 = arith.constant 0 : index
    %68 = vector.load %arg5[%c0_39, %c0_40] : memref<128x128xbf16, #tpu.memory_space<vmem>>, vector<128x128xbf16>
    %cst_41 = arith.constant dense<0.000000e+00> : vector<8x128xf32>
    %69 = tpu.matmul %18, %68, %cst_41 {dimension_numbers = #tpu.dot_dimension_numbers<[1], [0], [0], [1], [0, 0, 1, 1], [], []>} : vector<8x128xbf16>, vector<128x128xbf16>, vector<8x128xf32> -> vector<8x128xf32>
    %70 = arith.addf %67, %69 : vector<8x128xf32>
    %71 = math.tanh %70 : vector<8x128xf32>
    %72 = arith.negf %70 : vector<8x128xf32>
    %73 = math.exp %72 : vector<8x128xf32>
    %cst_42 = arith.constant 1.000000e+00 : f32
    %74 = vector.broadcast %cst_42 : f32 to vector<8x128xf32>
    %75 = arith.addf %74, %73 : vector<8x128xf32>
    %76 = arith.divf %74, %75 : vector<8x128xf32>
    %77 = arith.select %12, %71, %76 : vector<8x128xi1>, vector<8x128xf32>
    %c96_i32_43 = arith.constant 96 : i32
    %78 = tpu.dynamic_rotate %77 by %c96_i32_43 dim 1 : vector<8x128xf32>, i32 -> vector<8x128xf32>
    %c64_i32_44 = arith.constant 64 : i32
    %79 = tpu.dynamic_rotate %77 by %c64_i32_44 dim 1 : vector<8x128xf32>, i32 -> vector<8x128xf32>
    %c32_i32_45 = arith.constant 32 : i32
    %80 = tpu.dynamic_rotate %77 by %c32_i32_45 dim 1 : vector<8x128xf32>, i32 -> vector<8x128xf32>
    %81 = arith.mulf %78, %22 : vector<8x128xf32>
    %82 = arith.mulf %77, %79 : vector<8x128xf32>
    %83 = arith.addf %81, %82 : vector<8x128xf32>
    %84 = math.tanh %83 : vector<8x128xf32>
    %85 = arith.mulf %80, %84 : vector<8x128xf32>
    %86 = arith.truncf %85 : vector<8x128xf32> to vector<8x128xbf16>
    %c16 = arith.constant 16 : index
    %c0_46 = arith.constant 0 : index
    %87 = vector.load %arg16[%c16, %c0_46] : memref<64x128xf32, #tpu.memory_space<vmem>>, vector<8x128xf32>
    %c0_47 = arith.constant 0 : index
    %c0_48 = arith.constant 0 : index
    %88 = vector.load %arg2[%c0_47, %c0_48] : memref<128x128xbf16, #tpu.memory_space<vmem>>, vector<128x128xbf16>
    %cst_49 = arith.constant dense<0.000000e+00> : vector<8x128xf32>
    %89 = tpu.matmul %62, %88, %cst_49 {dimension_numbers = #tpu.dot_dimension_numbers<[1], [0], [0], [1], [0, 0, 1, 1], [], []>} : vector<8x128xbf16>, vector<128x128xbf16>, vector<8x128xf32> -> vector<8x128xf32>
    %90 = arith.addf %87, %89 : vector<8x128xf32>
    %91 = math.tanh %90 : vector<8x128xf32>
    %92 = arith.negf %90 : vector<8x128xf32>
    %93 = math.exp %92 : vector<8x128xf32>
    %cst_50 = arith.constant 1.000000e+00 : f32
    %94 = vector.broadcast %cst_50 : f32 to vector<8x128xf32>
    %95 = arith.addf %94, %93 : vector<8x128xf32>
    %96 = arith.divf %94, %95 : vector<8x128xf32>
    %97 = arith.select %12, %91, %96 : vector<8x128xi1>, vector<8x128xf32>
    %c96_i32_51 = arith.constant 96 : i32
    %98 = tpu.dynamic_rotate %97 by %c96_i32_51 dim 1 : vector<8x128xf32>, i32 -> vector<8x128xf32>
    %c64_i32_52 = arith.constant 64 : i32
    %99 = tpu.dynamic_rotate %97 by %c64_i32_52 dim 1 : vector<8x128xf32>, i32 -> vector<8x128xf32>
    %c32_i32_53 = arith.constant 32 : i32
    %100 = tpu.dynamic_rotate %97 by %c32_i32_53 dim 1 : vector<8x128xf32>, i32 -> vector<8x128xf32>
    %101 = arith.mulf %98, %59 : vector<8x128xf32>
    %102 = arith.mulf %97, %99 : vector<8x128xf32>
    %103 = arith.addf %101, %102 : vector<8x128xf32>
    %104 = math.tanh %103 : vector<8x128xf32>
    %105 = arith.mulf %100, %104 : vector<8x128xf32>
    %106 = arith.truncf %105 : vector<8x128xf32> to vector<8x128xbf16>
    %c0_54 = arith.constant 0 : index
    %c0_55 = arith.constant 0 : index
    %107 = vector.load %arg4[%c0_54, %c0_55] : memref<128x128xbf16, #tpu.memory_space<vmem>>, vector<128x128xbf16>
    %cst_56 = arith.constant dense<0.000000e+00> : vector<8x128xf32>
    %108 = tpu.matmul %62, %107, %cst_56 {dimension_numbers = #tpu.dot_dimension_numbers<[1], [0], [0], [1], [0, 0, 1, 1], [], []>} : vector<8x128xbf16>, vector<128x128xbf16>, vector<8x128xf32> -> vector<8x128xf32>
    %c0_57 = arith.constant 0 : index
    %c0_58 = arith.constant 0 : index
    %109 = vector.load %arg6[%c0_57, %c0_58] : memref<1x128xf32, #tpu.memory_space<vmem>>, vector<1x128xf32>
    %110 = vector.broadcast %109 : vector<1x128xf32> to vector<8x128xf32>
    %111 = arith.addf %108, %110 : vector<8x128xf32>
    %c0_59 = arith.constant 0 : index
    %c0_60 = arith.constant 0 : index
    %112 = vector.load %arg5[%c0_59, %c0_60] : memref<128x128xbf16, #tpu.memory_space<vmem>>, vector<128x128xbf16>
    %cst_61 = arith.constant dense<0.000000e+00> : vector<8x128xf32>
    %113 = tpu.matmul %86, %112, %cst_61 {dimension_numbers = #tpu.dot_dimension_numbers<[1], [0], [0], [1], [0, 0, 1, 1], [], []>} : vector<8x128xbf16>, vector<128x128xbf16>, vector<8x128xf32> -> vector<8x128xf32>
    %114 = arith.addf %111, %113 : vector<8x128xf32>
    %115 = math.tanh %114 : vector<8x128xf32>
    %116 = arith.negf %114 : vector<8x128xf32>
    %117 = math.exp %116 : vector<8x128xf32>
    %cst_62 = arith.constant 1.000000e+00 : f32
    %118 = vector.broadcast %cst_62 : f32 to vector<8x128xf32>
    %119 = arith.addf %118, %117 : vector<8x128xf32>
    %120 = arith.divf %118, %119 : vector<8x128xf32>
    %121 = arith.select %12, %115, %120 : vector<8x128xi1>, vector<8x128xf32>
    %c96_i32_63 = arith.constant 96 : i32
    %122 = tpu.dynamic_rotate %121 by %c96_i32_63 dim 1 : vector<8x128xf32>, i32 -> vector<8x128xf32>
    %c64_i32_64 = arith.constant 64 : i32
    %123 = tpu.dynamic_rotate %121 by %c64_i32_64 dim 1 : vector<8x128xf32>, i32 -> vector<8x128xf32>
    %c32_i32_65 = arith.constant 32 : i32
    %124 = tpu.dynamic_rotate %121 by %c32_i32_65 dim 1 : vector<8x128xf32>, i32 -> vector<8x128xf32>
    %125 = arith.mulf %122, %83 : vector<8x128xf32>
    %126 = arith.mulf %121, %123 : vector<8x128xf32>
    %127 = arith.addf %125, %126 : vector<8x128xf32>
    %128 = math.tanh %127 : vector<8x128xf32>
    %129 = arith.mulf %124, %128 : vector<8x128xf32>
    %130 = arith.truncf %129 : vector<8x128xf32> to vector<8x128xbf16>
    %c24 = arith.constant 24 : index
    %c0_66 = arith.constant 0 : index
    %131 = vector.load %arg16[%c24, %c0_66] : memref<64x128xf32, #tpu.memory_space<vmem>>, vector<8x128xf32>
    %c0_67 = arith.constant 0 : index
    %c0_68 = arith.constant 0 : index
    %132 = vector.load %arg2[%c0_67, %c0_68] : memref<128x128xbf16, #tpu.memory_space<vmem>>, vector<128x128xbf16>
    %cst_69 = arith.constant dense<0.000000e+00> : vector<8x128xf32>
    %133 = tpu.matmul %106, %132, %cst_69 {dimension_numbers = #tpu.dot_dimension_numbers<[1], [0], [0], [1], [0, 0, 1, 1], [], []>} : vector<8x128xbf16>, vector<128x128xbf16>, vector<8x128xf32> -> vector<8x128xf32>
    %134 = arith.addf %131, %133 : vector<8x128xf32>
    %135 = math.tanh %134 : vector<8x128xf32>
    %136 = arith.negf %134 : vector<8x128xf32>
    %137 = math.exp %136 : vector<8x128xf32>
    %cst_70 = arith.constant 1.000000e+00 : f32
    %138 = vector.broadcast %cst_70 : f32 to vector<8x128xf32>
    %139 = arith.addf %138, %137 : vector<8x128xf32>
    %140 = arith.divf %138, %139 : vector<8x128xf32>
    %141 = arith.select %12, %135, %140 : vector<8x128xi1>, vector<8x128xf32>
    %c96_i32_71 = arith.constant 96 : i32
    %142 = tpu.dynamic_rotate %141 by %c96_i32_71 dim 1 : vector<8x128xf32>, i32 -> vector<8x128xf32>
    %c64_i32_72 = arith.constant 64 : i32
    %143 = tpu.dynamic_rotate %141 by %c64_i32_72 dim 1 : vector<8x128xf32>, i32 -> vector<8x128xf32>
    %c32_i32_73 = arith.constant 32 : i32
    %144 = tpu.dynamic_rotate %141 by %c32_i32_73 dim 1 : vector<8x128xf32>, i32 -> vector<8x128xf32>
    %145 = arith.mulf %142, %103 : vector<8x128xf32>
    %146 = arith.mulf %141, %143 : vector<8x128xf32>
    %147 = arith.addf %145, %146 : vector<8x128xf32>
    %148 = math.tanh %147 : vector<8x128xf32>
    %149 = arith.mulf %144, %148 : vector<8x128xf32>
    %150 = arith.truncf %149 : vector<8x128xf32> to vector<8x128xbf16>
    %c0_74 = arith.constant 0 : index
    %c0_75 = arith.constant 0 : index
    %151 = vector.load %arg4[%c0_74, %c0_75] : memref<128x128xbf16, #tpu.memory_space<vmem>>, vector<128x128xbf16>
    %cst_76 = arith.constant dense<0.000000e+00> : vector<8x128xf32>
    %152 = tpu.matmul %106, %151, %cst_76 {dimension_numbers = #tpu.dot_dimension_numbers<[1], [0], [0], [1], [0, 0, 1, 1], [], []>} : vector<8x128xbf16>, vector<128x128xbf16>, vector<8x128xf32> -> vector<8x128xf32>
    %c0_77 = arith.constant 0 : index
    %c0_78 = arith.constant 0 : index
    %153 = vector.load %arg6[%c0_77, %c0_78] : memref<1x128xf32, #tpu.memory_space<vmem>>, vector<1x128xf32>
    %154 = vector.broadcast %153 : vector<1x128xf32> to vector<8x128xf32>
    %155 = arith.addf %152, %154 : vector<8x128xf32>
    %c0_79 = arith.constant 0 : index
    %c0_80 = arith.constant 0 : index
    %156 = vector.load %arg5[%c0_79, %c0_80] : memref<128x128xbf16, #tpu.memory_space<vmem>>, vector<128x128xbf16>
    %cst_81 = arith.constant dense<0.000000e+00> : vector<8x128xf32>
    %157 = tpu.matmul %130, %156, %cst_81 {dimension_numbers = #tpu.dot_dimension_numbers<[1], [0], [0], [1], [0, 0, 1, 1], [], []>} : vector<8x128xbf16>, vector<128x128xbf16>, vector<8x128xf32> -> vector<8x128xf32>
    %158 = arith.addf %155, %157 : vector<8x128xf32>
    %159 = math.tanh %158 : vector<8x128xf32>
    %160 = arith.negf %158 : vector<8x128xf32>
    %161 = math.exp %160 : vector<8x128xf32>
    %cst_82 = arith.constant 1.000000e+00 : f32
    %162 = vector.broadcast %cst_82 : f32 to vector<8x128xf32>
    %163 = arith.addf %162, %161 : vector<8x128xf32>
    %164 = arith.divf %162, %163 : vector<8x128xf32>
    %165 = arith.select %12, %159, %164 : vector<8x128xi1>, vector<8x128xf32>
    %c96_i32_83 = arith.constant 96 : i32
    %166 = tpu.dynamic_rotate %165 by %c96_i32_83 dim 1 : vector<8x128xf32>, i32 -> vector<8x128xf32>
    %c64_i32_84 = arith.constant 64 : i32
    %167 = tpu.dynamic_rotate %165 by %c64_i32_84 dim 1 : vector<8x128xf32>, i32 -> vector<8x128xf32>
    %c32_i32_85 = arith.constant 32 : i32
    %168 = tpu.dynamic_rotate %165 by %c32_i32_85 dim 1 : vector<8x128xf32>, i32 -> vector<8x128xf32>
    %169 = arith.mulf %166, %127 : vector<8x128xf32>
    %170 = arith.mulf %165, %167 : vector<8x128xf32>
    %171 = arith.addf %169, %170 : vector<8x128xf32>
    %172 = math.tanh %171 : vector<8x128xf32>
    %173 = arith.mulf %168, %172 : vector<8x128xf32>
    %174 = arith.truncf %173 : vector<8x128xf32> to vector<8x128xbf16>
    %c32 = arith.constant 32 : index
    %c0_86 = arith.constant 0 : index
    %175 = vector.load %arg16[%c32, %c0_86] : memref<64x128xf32, #tpu.memory_space<vmem>>, vector<8x128xf32>
    %c0_87 = arith.constant 0 : index
    %c0_88 = arith.constant 0 : index
    %176 = vector.load %arg2[%c0_87, %c0_88] : memref<128x128xbf16, #tpu.memory_space<vmem>>, vector<128x128xbf16>
    %cst_89 = arith.constant dense<0.000000e+00> : vector<8x128xf32>
    %177 = tpu.matmul %150, %176, %cst_89 {dimension_numbers = #tpu.dot_dimension_numbers<[1], [0], [0], [1], [0, 0, 1, 1], [], []>} : vector<8x128xbf16>, vector<128x128xbf16>, vector<8x128xf32> -> vector<8x128xf32>
    %178 = arith.addf %175, %177 : vector<8x128xf32>
    %179 = math.tanh %178 : vector<8x128xf32>
    %180 = arith.negf %178 : vector<8x128xf32>
    %181 = math.exp %180 : vector<8x128xf32>
    %cst_90 = arith.constant 1.000000e+00 : f32
    %182 = vector.broadcast %cst_90 : f32 to vector<8x128xf32>
    %183 = arith.addf %182, %181 : vector<8x128xf32>
    %184 = arith.divf %182, %183 : vector<8x128xf32>
    %185 = arith.select %12, %179, %184 : vector<8x128xi1>, vector<8x128xf32>
    %c96_i32_91 = arith.constant 96 : i32
    %186 = tpu.dynamic_rotate %185 by %c96_i32_91 dim 1 : vector<8x128xf32>, i32 -> vector<8x128xf32>
    %c64_i32_92 = arith.constant 64 : i32
    %187 = tpu.dynamic_rotate %185 by %c64_i32_92 dim 1 : vector<8x128xf32>, i32 -> vector<8x128xf32>
    %c32_i32_93 = arith.constant 32 : i32
    %188 = tpu.dynamic_rotate %185 by %c32_i32_93 dim 1 : vector<8x128xf32>, i32 -> vector<8x128xf32>
    %189 = arith.mulf %186, %147 : vector<8x128xf32>
    %190 = arith.mulf %185, %187 : vector<8x128xf32>
    %191 = arith.addf %189, %190 : vector<8x128xf32>
    %192 = math.tanh %191 : vector<8x128xf32>
    %193 = arith.mulf %188, %192 : vector<8x128xf32>
    %194 = arith.truncf %193 : vector<8x128xf32> to vector<8x128xbf16>
    %c0_94 = arith.constant 0 : index
    %c0_95 = arith.constant 0 : index
    %195 = vector.load %arg4[%c0_94, %c0_95] : memref<128x128xbf16, #tpu.memory_space<vmem>>, vector<128x128xbf16>
    %cst_96 = arith.constant dense<0.000000e+00> : vector<8x128xf32>
    %196 = tpu.matmul %150, %195, %cst_96 {dimension_numbers = #tpu.dot_dimension_numbers<[1], [0], [0], [1], [0, 0, 1, 1], [], []>} : vector<8x128xbf16>, vector<128x128xbf16>, vector<8x128xf32> -> vector<8x128xf32>
    %c0_97 = arith.constant 0 : index
    %c0_98 = arith.constant 0 : index
    %197 = vector.load %arg6[%c0_97, %c0_98] : memref<1x128xf32, #tpu.memory_space<vmem>>, vector<1x128xf32>
    %198 = vector.broadcast %197 : vector<1x128xf32> to vector<8x128xf32>
    %199 = arith.addf %196, %198 : vector<8x128xf32>
    %c0_99 = arith.constant 0 : index
    %c0_100 = arith.constant 0 : index
    %200 = vector.load %arg5[%c0_99, %c0_100] : memref<128x128xbf16, #tpu.memory_space<vmem>>, vector<128x128xbf16>
    %cst_101 = arith.constant dense<0.000000e+00> : vector<8x128xf32>
    %201 = tpu.matmul %174, %200, %cst_101 {dimension_numbers = #tpu.dot_dimension_numbers<[1], [0], [0], [1], [0, 0, 1, 1], [], []>} : vector<8x128xbf16>, vector<128x128xbf16>, vector<8x128xf32> -> vector<8x128xf32>
    %202 = arith.addf %199, %201 : vector<8x128xf32>
    %203 = math.tanh %202 : vector<8x128xf32>
    %204 = arith.negf %202 : vector<8x128xf32>
    %205 = math.exp %204 : vector<8x128xf32>
    %cst_102 = arith.constant 1.000000e+00 : f32
    %206 = vector.broadcast %cst_102 : f32 to vector<8x128xf32>
    %207 = arith.addf %206, %205 : vector<8x128xf32>
    %208 = arith.divf %206, %207 : vector<8x128xf32>
    %209 = arith.select %12, %203, %208 : vector<8x128xi1>, vector<8x128xf32>
    %c96_i32_103 = arith.constant 96 : i32
    %210 = tpu.dynamic_rotate %209 by %c96_i32_103 dim 1 : vector<8x128xf32>, i32 -> vector<8x128xf32>
    %c64_i32_104 = arith.constant 64 : i32
    %211 = tpu.dynamic_rotate %209 by %c64_i32_104 dim 1 : vector<8x128xf32>, i32 -> vector<8x128xf32>
    %c32_i32_105 = arith.constant 32 : i32
    %212 = tpu.dynamic_rotate %209 by %c32_i32_105 dim 1 : vector<8x128xf32>, i32 -> vector<8x128xf32>
    %213 = arith.mulf %210, %171 : vector<8x128xf32>
    %214 = arith.mulf %209, %211 : vector<8x128xf32>
    %215 = arith.addf %213, %214 : vector<8x128xf32>
    %216 = math.tanh %215 : vector<8x128xf32>
    %217 = arith.mulf %212, %216 : vector<8x128xf32>
    %218 = arith.truncf %217 : vector<8x128xf32> to vector<8x128xbf16>
    %c40 = arith.constant 40 : index
    %c0_106 = arith.constant 0 : index
    %219 = vector.load %arg16[%c40, %c0_106] : memref<64x128xf32, #tpu.memory_space<vmem>>, vector<8x128xf32>
    %c0_107 = arith.constant 0 : index
    %c0_108 = arith.constant 0 : index
    %220 = vector.load %arg2[%c0_107, %c0_108] : memref<128x128xbf16, #tpu.memory_space<vmem>>, vector<128x128xbf16>
    %cst_109 = arith.constant dense<0.000000e+00> : vector<8x128xf32>
    %221 = tpu.matmul %194, %220, %cst_109 {dimension_numbers = #tpu.dot_dimension_numbers<[1], [0], [0], [1], [0, 0, 1, 1], [], []>} : vector<8x128xbf16>, vector<128x128xbf16>, vector<8x128xf32> -> vector<8x128xf32>
    %222 = arith.addf %219, %221 : vector<8x128xf32>
    %223 = math.tanh %222 : vector<8x128xf32>
    %224 = arith.negf %222 : vector<8x128xf32>
    %225 = math.exp %224 : vector<8x128xf32>
    %cst_110 = arith.constant 1.000000e+00 : f32
    %226 = vector.broadcast %cst_110 : f32 to vector<8x128xf32>
    %227 = arith.addf %226, %225 : vector<8x128xf32>
    %228 = arith.divf %226, %227 : vector<8x128xf32>
    %229 = arith.select %12, %223, %228 : vector<8x128xi1>, vector<8x128xf32>
    %c96_i32_111 = arith.constant 96 : i32
    %230 = tpu.dynamic_rotate %229 by %c96_i32_111 dim 1 : vector<8x128xf32>, i32 -> vector<8x128xf32>
    %c64_i32_112 = arith.constant 64 : i32
    %231 = tpu.dynamic_rotate %229 by %c64_i32_112 dim 1 : vector<8x128xf32>, i32 -> vector<8x128xf32>
    %c32_i32_113 = arith.constant 32 : i32
    %232 = tpu.dynamic_rotate %229 by %c32_i32_113 dim 1 : vector<8x128xf32>, i32 -> vector<8x128xf32>
    %233 = arith.mulf %230, %191 : vector<8x128xf32>
    %234 = arith.mulf %229, %231 : vector<8x128xf32>
    %235 = arith.addf %233, %234 : vector<8x128xf32>
    %236 = math.tanh %235 : vector<8x128xf32>
    %237 = arith.mulf %232, %236 : vector<8x128xf32>
    %238 = arith.truncf %237 : vector<8x128xf32> to vector<8x128xbf16>
    %c0_114 = arith.constant 0 : index
    %c0_115 = arith.constant 0 : index
    %239 = vector.load %arg4[%c0_114, %c0_115] : memref<128x128xbf16, #tpu.memory_space<vmem>>, vector<128x128xbf16>
    %cst_116 = arith.constant dense<0.000000e+00> : vector<8x128xf32>
    %240 = tpu.matmul %194, %239, %cst_116 {dimension_numbers = #tpu.dot_dimension_numbers<[1], [0], [0], [1], [0, 0, 1, 1], [], []>} : vector<8x128xbf16>, vector<128x128xbf16>, vector<8x128xf32> -> vector<8x128xf32>
    %c0_117 = arith.constant 0 : index
    %c0_118 = arith.constant 0 : index
    %241 = vector.load %arg6[%c0_117, %c0_118] : memref<1x128xf32, #tpu.memory_space<vmem>>, vector<1x128xf32>
    %242 = vector.broadcast %241 : vector<1x128xf32> to vector<8x128xf32>
    %243 = arith.addf %240, %242 : vector<8x128xf32>
    %c0_119 = arith.constant 0 : index
    %c0_120 = arith.constant 0 : index
    %244 = vector.load %arg5[%c0_119, %c0_120] : memref<128x128xbf16, #tpu.memory_space<vmem>>, vector<128x128xbf16>
    %cst_121 = arith.constant dense<0.000000e+00> : vector<8x128xf32>
    %245 = tpu.matmul %218, %244, %cst_121 {dimension_numbers = #tpu.dot_dimension_numbers<[1], [0], [0], [1], [0, 0, 1, 1], [], []>} : vector<8x128xbf16>, vector<128x128xbf16>, vector<8x128xf32> -> vector<8x128xf32>
    %246 = arith.addf %243, %245 : vector<8x128xf32>
    %247 = math.tanh %246 : vector<8x128xf32>
    %248 = arith.negf %246 : vector<8x128xf32>
    %249 = math.exp %248 : vector<8x128xf32>
    %cst_122 = arith.constant 1.000000e+00 : f32
    %250 = vector.broadcast %cst_122 : f32 to vector<8x128xf32>
    %251 = arith.addf %250, %249 : vector<8x128xf32>
    %252 = arith.divf %250, %251 : vector<8x128xf32>
    %253 = arith.select %12, %247, %252 : vector<8x128xi1>, vector<8x128xf32>
    %c96_i32_123 = arith.constant 96 : i32
    %254 = tpu.dynamic_rotate %253 by %c96_i32_123 dim 1 : vector<8x128xf32>, i32 -> vector<8x128xf32>
    %c64_i32_124 = arith.constant 64 : i32
    %255 = tpu.dynamic_rotate %253 by %c64_i32_124 dim 1 : vector<8x128xf32>, i32 -> vector<8x128xf32>
    %c32_i32_125 = arith.constant 32 : i32
    %256 = tpu.dynamic_rotate %253 by %c32_i32_125 dim 1 : vector<8x128xf32>, i32 -> vector<8x128xf32>
    %257 = arith.mulf %254, %215 : vector<8x128xf32>
    %258 = arith.mulf %253, %255 : vector<8x128xf32>
    %259 = arith.addf %257, %258 : vector<8x128xf32>
    %260 = math.tanh %259 : vector<8x128xf32>
    %261 = arith.mulf %256, %260 : vector<8x128xf32>
    %262 = arith.truncf %261 : vector<8x128xf32> to vector<8x128xbf16>
    %c48 = arith.constant 48 : index
    %c0_126 = arith.constant 0 : index
    %263 = vector.load %arg16[%c48, %c0_126] : memref<64x128xf32, #tpu.memory_space<vmem>>, vector<8x128xf32>
    %c0_127 = arith.constant 0 : index
    %c0_128 = arith.constant 0 : index
    %264 = vector.load %arg2[%c0_127, %c0_128] : memref<128x128xbf16, #tpu.memory_space<vmem>>, vector<128x128xbf16>
    %cst_129 = arith.constant dense<0.000000e+00> : vector<8x128xf32>
    %265 = tpu.matmul %238, %264, %cst_129 {dimension_numbers = #tpu.dot_dimension_numbers<[1], [0], [0], [1], [0, 0, 1, 1], [], []>} : vector<8x128xbf16>, vector<128x128xbf16>, vector<8x128xf32> -> vector<8x128xf32>
    %266 = arith.addf %263, %265 : vector<8x128xf32>
    %267 = math.tanh %266 : vector<8x128xf32>
    %268 = arith.negf %266 : vector<8x128xf32>
    %269 = math.exp %268 : vector<8x128xf32>
    %cst_130 = arith.constant 1.000000e+00 : f32
    %270 = vector.broadcast %cst_130 : f32 to vector<8x128xf32>
    %271 = arith.addf %270, %269 : vector<8x128xf32>
    %272 = arith.divf %270, %271 : vector<8x128xf32>
    %273 = arith.select %12, %267, %272 : vector<8x128xi1>, vector<8x128xf32>
    %c96_i32_131 = arith.constant 96 : i32
    %274 = tpu.dynamic_rotate %273 by %c96_i32_131 dim 1 : vector<8x128xf32>, i32 -> vector<8x128xf32>
    %c64_i32_132 = arith.constant 64 : i32
    %275 = tpu.dynamic_rotate %273 by %c64_i32_132 dim 1 : vector<8x128xf32>, i32 -> vector<8x128xf32>
    %c32_i32_133 = arith.constant 32 : i32
    %276 = tpu.dynamic_rotate %273 by %c32_i32_133 dim 1 : vector<8x128xf32>, i32 -> vector<8x128xf32>
    %277 = arith.mulf %274, %235 : vector<8x128xf32>
    %278 = arith.mulf %273, %275 : vector<8x128xf32>
    %279 = arith.addf %277, %278 : vector<8x128xf32>
    %280 = math.tanh %279 : vector<8x128xf32>
    %281 = arith.mulf %276, %280 : vector<8x128xf32>
    %282 = arith.truncf %281 : vector<8x128xf32> to vector<8x128xbf16>
    %c0_134 = arith.constant 0 : index
    %c0_135 = arith.constant 0 : index
    %283 = vector.load %arg4[%c0_134, %c0_135] : memref<128x128xbf16, #tpu.memory_space<vmem>>, vector<128x128xbf16>
    %cst_136 = arith.constant dense<0.000000e+00> : vector<8x128xf32>
    %284 = tpu.matmul %238, %283, %cst_136 {dimension_numbers = #tpu.dot_dimension_numbers<[1], [0], [0], [1], [0, 0, 1, 1], [], []>} : vector<8x128xbf16>, vector<128x128xbf16>, vector<8x128xf32> -> vector<8x128xf32>
    %c0_137 = arith.constant 0 : index
    %c0_138 = arith.constant 0 : index
    %285 = vector.load %arg6[%c0_137, %c0_138] : memref<1x128xf32, #tpu.memory_space<vmem>>, vector<1x128xf32>
    %286 = vector.broadcast %285 : vector<1x128xf32> to vector<8x128xf32>
    %287 = arith.addf %284, %286 : vector<8x128xf32>
    %c0_139 = arith.constant 0 : index
    %c0_140 = arith.constant 0 : index
    %288 = vector.load %arg5[%c0_139, %c0_140] : memref<128x128xbf16, #tpu.memory_space<vmem>>, vector<128x128xbf16>
    %cst_141 = arith.constant dense<0.000000e+00> : vector<8x128xf32>
    %289 = tpu.matmul %262, %288, %cst_141 {dimension_numbers = #tpu.dot_dimension_numbers<[1], [0], [0], [1], [0, 0, 1, 1], [], []>} : vector<8x128xbf16>, vector<128x128xbf16>, vector<8x128xf32> -> vector<8x128xf32>
    %290 = arith.addf %287, %289 : vector<8x128xf32>
    %291 = math.tanh %290 : vector<8x128xf32>
    %292 = arith.negf %290 : vector<8x128xf32>
    %293 = math.exp %292 : vector<8x128xf32>
    %cst_142 = arith.constant 1.000000e+00 : f32
    %294 = vector.broadcast %cst_142 : f32 to vector<8x128xf32>
    %295 = arith.addf %294, %293 : vector<8x128xf32>
    %296 = arith.divf %294, %295 : vector<8x128xf32>
    %297 = arith.select %12, %291, %296 : vector<8x128xi1>, vector<8x128xf32>
    %c96_i32_143 = arith.constant 96 : i32
    %298 = tpu.dynamic_rotate %297 by %c96_i32_143 dim 1 : vector<8x128xf32>, i32 -> vector<8x128xf32>
    %c64_i32_144 = arith.constant 64 : i32
    %299 = tpu.dynamic_rotate %297 by %c64_i32_144 dim 1 : vector<8x128xf32>, i32 -> vector<8x128xf32>
    %c32_i32_145 = arith.constant 32 : i32
    %300 = tpu.dynamic_rotate %297 by %c32_i32_145 dim 1 : vector<8x128xf32>, i32 -> vector<8x128xf32>
    %301 = arith.mulf %298, %259 : vector<8x128xf32>
    %302 = arith.mulf %297, %299 : vector<8x128xf32>
    %303 = arith.addf %301, %302 : vector<8x128xf32>
    %304 = math.tanh %303 : vector<8x128xf32>
    %305 = arith.mulf %300, %304 : vector<8x128xf32>
    %306 = arith.truncf %305 : vector<8x128xf32> to vector<8x128xbf16>
    %c56 = arith.constant 56 : index
    %c0_146 = arith.constant 0 : index
    %307 = vector.load %arg16[%c56, %c0_146] : memref<64x128xf32, #tpu.memory_space<vmem>>, vector<8x128xf32>
    %c0_147 = arith.constant 0 : index
    %c0_148 = arith.constant 0 : index
    %308 = vector.load %arg2[%c0_147, %c0_148] : memref<128x128xbf16, #tpu.memory_space<vmem>>, vector<128x128xbf16>
    %cst_149 = arith.constant dense<0.000000e+00> : vector<8x128xf32>
    %309 = tpu.matmul %282, %308, %cst_149 {dimension_numbers = #tpu.dot_dimension_numbers<[1], [0], [0], [1], [0, 0, 1, 1], [], []>} : vector<8x128xbf16>, vector<128x128xbf16>, vector<8x128xf32> -> vector<8x128xf32>
    %310 = arith.addf %307, %309 : vector<8x128xf32>
    %311 = math.tanh %310 : vector<8x128xf32>
    %312 = arith.negf %310 : vector<8x128xf32>
    %313 = math.exp %312 : vector<8x128xf32>
    %cst_150 = arith.constant 1.000000e+00 : f32
    %314 = vector.broadcast %cst_150 : f32 to vector<8x128xf32>
    %315 = arith.addf %314, %313 : vector<8x128xf32>
    %316 = arith.divf %314, %315 : vector<8x128xf32>
    %317 = arith.select %12, %311, %316 : vector<8x128xi1>, vector<8x128xf32>
    %c96_i32_151 = arith.constant 96 : i32
    %318 = tpu.dynamic_rotate %317 by %c96_i32_151 dim 1 : vector<8x128xf32>, i32 -> vector<8x128xf32>
    %c64_i32_152 = arith.constant 64 : i32
    %319 = tpu.dynamic_rotate %317 by %c64_i32_152 dim 1 : vector<8x128xf32>, i32 -> vector<8x128xf32>
    %c32_i32_153 = arith.constant 32 : i32
    %320 = tpu.dynamic_rotate %317 by %c32_i32_153 dim 1 : vector<8x128xf32>, i32 -> vector<8x128xf32>
    %321 = arith.mulf %318, %279 : vector<8x128xf32>
    %322 = arith.mulf %317, %319 : vector<8x128xf32>
    %323 = arith.addf %321, %322 : vector<8x128xf32>
    %324 = math.tanh %323 : vector<8x128xf32>
    %325 = arith.mulf %320, %324 : vector<8x128xf32>
    %326 = arith.truncf %325 : vector<8x128xf32> to vector<8x128xbf16>
    %c0_154 = arith.constant 0 : index
    %c0_155 = arith.constant 0 : index
    %327 = vector.load %arg4[%c0_154, %c0_155] : memref<128x128xbf16, #tpu.memory_space<vmem>>, vector<128x128xbf16>
    %cst_156 = arith.constant dense<0.000000e+00> : vector<8x128xf32>
    %328 = tpu.matmul %282, %327, %cst_156 {dimension_numbers = #tpu.dot_dimension_numbers<[1], [0], [0], [1], [0, 0, 1, 1], [], []>} : vector<8x128xbf16>, vector<128x128xbf16>, vector<8x128xf32> -> vector<8x128xf32>
    %c0_157 = arith.constant 0 : index
    %c0_158 = arith.constant 0 : index
    %329 = vector.load %arg6[%c0_157, %c0_158] : memref<1x128xf32, #tpu.memory_space<vmem>>, vector<1x128xf32>
    %330 = vector.broadcast %329 : vector<1x128xf32> to vector<8x128xf32>
    %331 = arith.addf %328, %330 : vector<8x128xf32>
    %c0_159 = arith.constant 0 : index
    %c0_160 = arith.constant 0 : index
    %332 = vector.load %arg5[%c0_159, %c0_160] : memref<128x128xbf16, #tpu.memory_space<vmem>>, vector<128x128xbf16>
    %cst_161 = arith.constant dense<0.000000e+00> : vector<8x128xf32>
    %333 = tpu.matmul %306, %332, %cst_161 {dimension_numbers = #tpu.dot_dimension_numbers<[1], [0], [0], [1], [0, 0, 1, 1], [], []>} : vector<8x128xbf16>, vector<128x128xbf16>, vector<8x128xf32> -> vector<8x128xf32>
    %334 = arith.addf %331, %333 : vector<8x128xf32>
    %335 = math.tanh %334 : vector<8x128xf32>
    %336 = arith.negf %334 : vector<8x128xf32>
    %337 = math.exp %336 : vector<8x128xf32>
    %cst_162 = arith.constant 1.000000e+00 : f32
    %338 = vector.broadcast %cst_162 : f32 to vector<8x128xf32>
    %339 = arith.addf %338, %337 : vector<8x128xf32>
    %340 = arith.divf %338, %339 : vector<8x128xf32>
    %341 = arith.select %12, %335, %340 : vector<8x128xi1>, vector<8x128xf32>
    %c96_i32_163 = arith.constant 96 : i32
    %342 = tpu.dynamic_rotate %341 by %c96_i32_163 dim 1 : vector<8x128xf32>, i32 -> vector<8x128xf32>
    %c64_i32_164 = arith.constant 64 : i32
    %343 = tpu.dynamic_rotate %341 by %c64_i32_164 dim 1 : vector<8x128xf32>, i32 -> vector<8x128xf32>
    %c32_i32_165 = arith.constant 32 : i32
    %344 = tpu.dynamic_rotate %341 by %c32_i32_165 dim 1 : vector<8x128xf32>, i32 -> vector<8x128xf32>
    %345 = arith.mulf %342, %303 : vector<8x128xf32>
    %346 = arith.mulf %341, %343 : vector<8x128xf32>
    %347 = arith.addf %345, %346 : vector<8x128xf32>
    %348 = math.tanh %347 : vector<8x128xf32>
    %349 = arith.mulf %344, %348 : vector<8x128xf32>
    %350 = arith.truncf %349 : vector<8x128xf32> to vector<8x128xbf16>
    %c0_166 = arith.constant 0 : index
    %c0_167 = arith.constant 0 : index
    %351 = vector.load %arg4[%c0_166, %c0_167] : memref<128x128xbf16, #tpu.memory_space<vmem>>, vector<128x128xbf16>
    %cst_168 = arith.constant dense<0.000000e+00> : vector<8x128xf32>
    %352 = tpu.matmul %326, %351, %cst_168 {dimension_numbers = #tpu.dot_dimension_numbers<[1], [0], [0], [1], [0, 0, 1, 1], [], []>} : vector<8x128xbf16>, vector<128x128xbf16>, vector<8x128xf32> -> vector<8x128xf32>
    %c0_169 = arith.constant 0 : index
    %c0_170 = arith.constant 0 : index
    %353 = vector.load %arg6[%c0_169, %c0_170] : memref<1x128xf32, #tpu.memory_space<vmem>>, vector<1x128xf32>
    %354 = vector.broadcast %353 : vector<1x128xf32> to vector<8x128xf32>
    %355 = arith.addf %352, %354 : vector<8x128xf32>
    %c0_171 = arith.constant 0 : index
    %c0_172 = arith.constant 0 : index
    %356 = vector.load %arg5[%c0_171, %c0_172] : memref<128x128xbf16, #tpu.memory_space<vmem>>, vector<128x128xbf16>
    %cst_173 = arith.constant dense<0.000000e+00> : vector<8x128xf32>
    %357 = tpu.matmul %350, %356, %cst_173 {dimension_numbers = #tpu.dot_dimension_numbers<[1], [0], [0], [1], [0, 0, 1, 1], [], []>} : vector<8x128xbf16>, vector<128x128xbf16>, vector<8x128xf32> -> vector<8x128xf32>
    %358 = arith.addf %355, %357 : vector<8x128xf32>
    %359 = math.tanh %358 : vector<8x128xf32>
    %360 = arith.negf %358 : vector<8x128xf32>
    %361 = math.exp %360 : vector<8x128xf32>
    %cst_174 = arith.constant 1.000000e+00 : f32
    %362 = vector.broadcast %cst_174 : f32 to vector<8x128xf32>
    %363 = arith.addf %362, %361 : vector<8x128xf32>
    %364 = arith.divf %362, %363 : vector<8x128xf32>
    %365 = arith.select %12, %359, %364 : vector<8x128xi1>, vector<8x128xf32>
    %c96_i32_175 = arith.constant 96 : i32
    %366 = tpu.dynamic_rotate %365 by %c96_i32_175 dim 1 : vector<8x128xf32>, i32 -> vector<8x128xf32>
    %c64_i32_176 = arith.constant 64 : i32
    %367 = tpu.dynamic_rotate %365 by %c64_i32_176 dim 1 : vector<8x128xf32>, i32 -> vector<8x128xf32>
    %c32_i32_177 = arith.constant 32 : i32
    %368 = tpu.dynamic_rotate %365 by %c32_i32_177 dim 1 : vector<8x128xf32>, i32 -> vector<8x128xf32>
    %369 = arith.mulf %366, %347 : vector<8x128xf32>
    %370 = arith.mulf %365, %367 : vector<8x128xf32>
    %371 = arith.addf %369, %370 : vector<8x128xf32>
    %372 = math.tanh %371 : vector<8x128xf32>
    %373 = arith.mulf %368, %372 : vector<8x128xf32>
    %374 = arith.truncf %373 : vector<8x128xf32> to vector<8x128xbf16>
    %c0_178 = arith.constant 0 : index
    %c0_179 = arith.constant 0 : index
    %c0_180 = arith.constant 0 : index
    %375 = vector.load %arg14[%c0_178, %c0_179, %c0_180] : memref<2x8x128xf32, #tpu.memory_space<vmem>>, vector<1x8x128xf32>
    %376 = vector.shape_cast %375 : vector<1x8x128xf32> to vector<8x128xf32>
    %377 = vector.shape_cast %325 : vector<8x128xf32> to vector<1x8x128xf32>
    tpu.vector_store %arg14[%c0_178, %c0_179, %c0_180], %377 {strides = array<i32>} : memref<2x8x128xf32, #tpu.memory_space<vmem>>, vector<1x8x128xf32>,
    %c0_181 = arith.constant 0 : index
    %c0_182 = arith.constant 0 : index
    %c0_183 = arith.constant 0 : index
    %378 = vector.load %arg15[%c0_181, %c0_182, %c0_183] : memref<2x8x128xf32, #tpu.memory_space<vmem>>, vector<1x8x128xf32>
    %379 = vector.shape_cast %378 : vector<1x8x128xf32> to vector<8x128xf32>
    %380 = vector.shape_cast %323 : vector<8x128xf32> to vector<1x8x128xf32>
    tpu.vector_store %arg15[%c0_181, %c0_182, %c0_183], %380 {strides = array<i32>} : memref<2x8x128xf32, #tpu.memory_space<vmem>>, vector<1x8x128xf32>,
    %c1_184 = arith.constant 1 : index
    %c0_185 = arith.constant 0 : index
    %c0_186 = arith.constant 0 : index
    %381 = vector.load %arg14[%c1_184, %c0_185, %c0_186] : memref<2x8x128xf32, #tpu.memory_space<vmem>>, vector<1x8x128xf32>
    %382 = vector.shape_cast %381 : vector<1x8x128xf32> to vector<8x128xf32>
    %383 = vector.shape_cast %373 : vector<8x128xf32> to vector<1x8x128xf32>
    tpu.vector_store %arg14[%c1_184, %c0_185, %c0_186], %383 {strides = array<i32>} : memref<2x8x128xf32, #tpu.memory_space<vmem>>, vector<1x8x128xf32>,
    %c1_187 = arith.constant 1 : index
    %c0_188 = arith.constant 0 : index
    %c0_189 = arith.constant 0 : index
    %384 = vector.load %arg15[%c1_187, %c0_188, %c0_189] : memref<2x8x128xf32, #tpu.memory_space<vmem>>, vector<1x8x128xf32>
    %385 = vector.shape_cast %384 : vector<1x8x128xf32> to vector<8x128xf32>
    %386 = vector.shape_cast %371 : vector<8x128xf32> to vector<1x8x128xf32>
    tpu.vector_store %arg15[%c1_187, %c0_188, %c0_189], %386 {strides = array<i32>} : memref<2x8x128xf32, #tpu.memory_space<vmem>>, vector<1x8x128xf32>,
    %c0_190 = arith.constant 0 : index
    %c0_191 = arith.constant 0 : index
    %387 = vector.load %arg7[%c0_190, %c0_191] : memref<128x128xbf16, #tpu.memory_space<vmem>>, vector<128x128xbf16>
    %cst_192 = arith.constant dense<0.000000e+00> : vector<8x128xf32>
    %388 = tpu.matmul %374, %387, %cst_192 {dimension_numbers = #tpu.dot_dimension_numbers<[1], [0], [0], [1], [0, 0, 1, 1], [], []>} : vector<8x128xbf16>, vector<128x128xbf16>, vector<8x128xf32> -> vector<8x128xf32>
    %c0_193 = arith.constant 0 : index
    %c0_194 = arith.constant 0 : index
    %389 = vector.load %arg8[%c0_193, %c0_194] : memref<1x128xf32, #tpu.memory_space<vmem>>, vector<1x128xf32>
    %390 = vector.broadcast %389 : vector<1x128xf32> to vector<8x128xf32>
    %391 = arith.addf %388, %390 : vector<8x128xf32>
    %392 = arith.truncf %391 : vector<8x128xf32> to vector<8x128xbf16>
    %c0_195 = arith.constant 0 : index
    %c0_196 = arith.constant 0 : index
    %393 = vector.load %arg9[%c0_195, %c0_196] : memref<128x128xbf16, #tpu.memory_space<vmem>>, vector<128x128xbf16>
    %cst_197 = arith.constant dense<0.000000e+00> : vector<8x128xf32>
    %394 = tpu.matmul %392, %393, %cst_197 {dimension_numbers = #tpu.dot_dimension_numbers<[1], [0], [0], [1], [0, 0, 1, 1], [], []>} : vector<8x128xbf16>, vector<128x128xbf16>, vector<8x128xf32> -> vector<8x128xf32>
    %c0_198 = arith.constant 0 : index
    %c0_199 = arith.constant 0 : index
    %395 = vector.load %arg10[%c0_198, %c0_199] : memref<1x128xf32, #tpu.memory_space<vmem>>, vector<1x128xf32>
    %396 = vector.broadcast %395 : vector<1x128xf32> to vector<8x128xf32>
    %397 = arith.addf %394, %396 : vector<8x128xf32>
    %c0_200 = arith.constant 0 : index
    %c0_201 = arith.constant 0 : index
    %398 = vector.load %arg13[%c0_200, %c0_201] : memref<8x128xf32, #tpu.memory_space<vmem>>, vector<8x128xf32>
    tpu.vector_store %arg13[%c0_200, %c0_201], %397 {strides = array<i32>} : memref<8x128xf32, #tpu.memory_space<vmem>>, vector<8x128xf32>,
    return
  }
}

</mosaic_0001>

<bundles_post_ra>
// kernel: tpu_custom_call.1
= control target key start
LH: loop header
LB: loop body
LE: loop exit
PB: predicated region body
PF: predicated region fallthrough
CT: control target
= control target key end

     0   :  { %21 = vsyncpa [#allocation4], 0  ;;  %s4694_s0 = inlined_call_operand.hbm [shape: bf16[64,8], index: 0, kind: input, shape index: {}]   ;;  %s4695_s1 = inlined_call_operand.hbm [shape: bf16[8,128], index: 1, kind: input, shape index: {}]   ;;  %s4696_s2 = inlined_call_operand.hbm [shape: bf16[128,128], index: 2, kind: input, shape index: {}]   ;;  %s4697_s3 = inlined_call_operand.hbm [shape: f32[1,128], index: 3, kind: input, shape index: {}]   ;;  %s4698_s4 = inlined_call_operand.hbm [shape: bf16[128,128], index: 4, kind: input, shape index: {}]   ;;  %s4699_s5 = inlined_call_operand.hbm [shape: bf16[128,128], index: 5, kind: input, shape index: {}]   ;;  %s4700_s6 = inlined_call_operand.hbm [shape: f32[1,128], index: 6, kind: input, shape index: {}]   ;;  %s4701_s7 = inlined_call_operand.hbm [shape: bf16[128,128], index: 7, kind: input, shape index: {}]   ;;  %s4702_s8 = inlined_call_operand.hbm [shape: f32[1,128], index: 8, kind: input, shape index: {}]   ;;  %s4703_s9 = inlined_call_operand.hbm [shape: bf16[128,128], index: 9, kind: input, shape index: {}]   ;;  %s4704_s10 = inlined_call_operand.hbm [shape: f32[1,128], index: 10, kind: input, shape index: {}]   ;;  %s4705_s11 = inlined_call_operand.hbm [shape: f32[2,8,128], index: 11, kind: input, shape index: {}, may-alias: {11,14}]   ;;  %s4706_s12 = inlined_call_operand.hbm [shape: f32[2,8,128], index: 12, kind: input, shape index: {}, may-alias: {12,15}]   ;;  %s4707_s13 = inlined_call_operand.hbm [shape: f32[8,128], index: 13, kind: output, shape index: {0}]   ;;  %s4708_s14 = inlined_call_operand.hbm [shape: f32[2,8,128], index: 14, kind: output, shape index: {1}, may-alias: {11,14}]   ;;  %s4709_s15 = inlined_call_operand.hbm [shape: f32[2,8,128], index: 15, kind: output, shape index: {2}, may-alias: {12,15}]  }
   0x1   :  { %22 = vsyncpa [#allocation7], 0 }
   0x2   :  { %23 = vsyncpa [#allocation10], 0 }
   0x3   :  { %24 = vsyncpa [#allocation13], 0 }
   0x4   :  { %25 = vsyncpa [#allocation16], 0 }
   0x5   :  { %26 = vsyncpa [#allocation19], 0 }
   0x6   :  { %27 = vsyncpa [#allocation22], 0 }
   0x7   :  { %28 = vsyncpa [#allocation5], 0 }
   0x8   :  { %29 = vsyncpa [#allocation26], 0  ;;  %s3610_s18 = smov [#allocation6]   ;;  %s3611_s20 = smov [#allocation9]  }
   0x9   :  { %s48_s19 = sshll.u32 %s3610_s18, 4  ;;  %s70_s21 = sshll.u32 %s3611_s20, 4  ;;  %s49_s19 = int_to_ptr.vmem [resolvable:$true] %s48_s19  ;;  %s71_s21 = int_to_ptr.vmem [resolvable:$true] %s70_s21 }
   0xa   :  { %s3240_s24 = scalar_lea.hbm %s4695_s1, 64 }
   0xb   :  { %p3241_p0 = scmp.ne.s32.totalorder %s4695_s1, %s3240_s24  ;;  %p3244_p1 = scmp.lt.u32.totalorder %s3240_s24, %s4695_s1 }
   0xd   :  { %p3246_p2 = pnand %p3244_p1, %p3241_p0 }
   0xf   :  { %3249 = shalt.err (!%p3246_p2)
}
  0x10   :  { %s3250_s29 = scalar_lea.vmem %s49_s19, 64  ;;  %p3255_p4 = scmp.lt.s32.totalorder %s49_s19, %s49_s19 }
  0x11   :  { %p3251_p3 = scmp.ne.s32.totalorder %s49_s19, %s3250_s29  ;;  %p3256_p5 = scmp.lt.s32.totalorder %s3250_s29, %s3250_s29 }
  0x13   :  { %p3257_p6 = por %p3256_p5, %p3255_p4 }
  0x15   :  { %p3258_p7 = pnand %p3257_p6, %p3251_p3 }
  0x17   :  { %3261 = shalt.err (!%p3258_p7)
}
  0x18   :  { %51 = dma.hbm_to_vmem [thread:$0]  %s4695_s1, 64, %s49_s19, [#allocation7]  }
  0x19   :  { %s3262_s20 = scalar_lea.hbm %s4697_s3, 16 }
  0x1a   :  { %p3263_p8 = scmp.ne.s32.totalorder %s4697_s3, %s3262_s20  ;;  %p3266_p9 = scmp.lt.u32.totalorder %s3262_s20, %s4697_s3 }
  0x1c   :  { %p3268_p10 = pnand %p3266_p9, %p3263_p8 }
  0x1e   :  { %3271 = shalt.err (!%p3268_p10)
}
  0x1f   :  { %s3272_s26 = scalar_lea.vmem %s71_s21, 16  ;;  %s3276_s27 = scalar_lea.vmem %s71_s21, 32 }
  0x20   :  { %p3273_p11 = scmp.ne.s32.totalorder %s71_s21, %s3272_s26  ;;  %p3277_p12 = scmp.lt.s32.totalorder %s71_s21, %s71_s21 }
  0x21   :  { %p3278_p13 = scmp.lt.s32.totalorder %s3276_s27, %s3272_s26 }
  0x23   :  { %p3279_p0 = por %p3278_p13, %p3277_p12 }
  0x25   :  { %p3280_p1 = pnand %p3279_p0, %p3273_p11 }
  0x27   :  { %3283 = shalt.err (!%p3280_p1)
}
  0x28   :  { %73 = dma.hbm_to_vmem [thread:$0]  %s4697_s3, 16, %s71_s21, [#allocation10]  }
  0x29   :  { %s3612_s28 = smov [#allocation12]   ;;  %s3613_s30 = smov [#allocation15]  }
  0x2a   :  { %s91_s29 = sshll.u32 %s3612_s28, 4  ;;  %s113_s16 = sshll.u32 %s3613_s30, 4  ;;  %s92_s29 = int_to_ptr.vmem [resolvable:$true] %s91_s29  ;;  %s3738_s16 = int_to_ptr.vmem [resolvable:$true] %s113_s16 }
  0x2b   :  { %s3284_s20 = scalar_lea.hbm %s4699_s5, 1024 }
  0x2c   :  { %p3285_p2 = scmp.ne.s32.totalorder %s4699_s5, %s3284_s20  ;;  %p3288_p3 = scmp.lt.u32.totalorder %s3284_s20, %s4699_s5 }
  0x2e   :  { %p3290_p4 = pnand %p3288_p3, %p3285_p2 }
  0x30   :  { %3293 = shalt.err (!%p3290_p4)
}
  0x31   :  { %s3294_s3 = scalar_lea.vmem %s92_s29, 1024  ;;  %p3299_p6 = scmp.lt.s32.totalorder %s92_s29, %s92_s29 }
  0x32   :  { %p3295_p5 = scmp.ne.s32.totalorder %s92_s29, %s3294_s3  ;;  %p3300_p7 = scmp.lt.s32.totalorder %s3294_s3, %s3294_s3 }
  0x34   :  { %p3301_p8 = por %p3300_p7, %p3299_p6 }
  0x36   :  { %p3302_p9 = pnand %p3301_p8, %p3295_p5 }
  0x38   :  { %3305 = shalt.err (!%p3302_p9)
}
  0x39   :  { %s3614_s21 = smov 64   ;;  %s3615_s26 = smov 4  }
  0x3a   :  { %97 = dma.hbm_to_vmem [thread:$0]  %s4699_s5, 1024, %s92_s29, [#allocation13], %s3614_s21, %s3614_s21, %s3615_s26  }
  0x3b   :  { %s3306_s30 = scalar_lea.hbm %s4701_s7, 1024 }
  0x3c   :  { %p3307_p10 = scmp.ne.s32.totalorder %s4701_s7, %s3306_s30  ;;  %p3310_p11 = scmp.lt.u32.totalorder %s3306_s30, %s4701_s7 }
  0x3e   :  { %p3312_p12 = pnand %p3310_p11, %p3307_p10 }
  0x40   :  { %3315 = shalt.err (!%p3312_p12)
}
  0x41   :  { %s3316_s23 = scalar_lea.vmem %s3738_s16, 1024  ;;  %p3321_p0 = scmp.lt.s32.totalorder %s3738_s16, %s3738_s16 }
  0x42   :  { %p3317_p13 = scmp.ne.s32.totalorder %s3738_s16, %s3316_s23  ;;  %p3322_p1 = scmp.lt.s32.totalorder %s3316_s23, %s3316_s23 }
  0x44   :  { %p3323_p2 = por %p3322_p1, %p3321_p0 }
  0x46   :  { %p3324_p3 = pnand %p3323_p2, %p3317_p13 }
  0x48   :  { %3327 = shalt.err (!%p3324_p3)
}
  0x49   :  { %119 = dma.hbm_to_vmem [thread:$0]  %s4701_s7, 1024, %s3738_s16, [#allocation16], %s3614_s21, %s3614_s21, %s3615_s26  }
  0x4a   :  { %s3616_s24 = smov [#allocation18]   ;;  %s3617_s3 = smov [#allocation21]  }
  0x4b   :  { %s135_s25 = sshll.u32 %s3616_s24, 4  ;;  %s157_s27 = sshll.u32 %s3617_s3, 4  ;;  %s136_s25 = int_to_ptr.vmem [resolvable:$true] %s135_s25  ;;  %s3775_s27 = int_to_ptr.vmem [resolvable:$true] %s157_s27 }
  0x4c   :  { %s3328_s28 = scalar_lea.hbm %s4703_s9, 1024 }
  0x4d   :  { %p3329_p4 = scmp.ne.s32.totalorder %s4703_s9, %s3328_s28  ;;  %p3332_p5 = scmp.lt.u32.totalorder %s3328_s28, %s4703_s9 }
  0x4f   :  { %p3334_p6 = pnand %p3332_p5, %p3329_p4 }
  0x51   :  { %3337 = shalt.err (!%p3334_p6)
}
  0x52   :  { %s3338_s7 = scalar_lea.vmem %s136_s25, 1024  ;;  %p3343_p8 = scmp.lt.s32.totalorder %s136_s25, %s136_s25 }
  0x53   :  { %p3339_p7 = scmp.ne.s32.totalorder %s136_s25, %s3338_s7  ;;  %p3344_p9 = scmp.lt.s32.totalorder %s3338_s7, %s3338_s7 }
  0x55   :  { %p3345_p10 = por %p3344_p9, %p3343_p8 }
  0x57   :  { %p3346_p11 = pnand %p3345_p10, %p3339_p7 }
  0x59   :  { %3349 = shalt.err (!%p3346_p11)
}
  0x5a   :  { %141 = dma.hbm_to_vmem [thread:$0]  %s4703_s9, 1024, %s136_s25, [#allocation19], %s3614_s21, %s3614_s21, %s3615_s26  }
  0x5b   :  { %s3350_s29 = scalar_lea.hbm %s4705_s11, 256 }
  0x5c   :  { %p3351_p12 = scmp.ne.s32.totalorder %s4705_s11, %s3350_s29  ;;  %p3354_p13 = scmp.lt.u32.totalorder %s3350_s29, %s4705_s11 }
  0x5e   :  { %p3356_p0 = pnand %p3354_p13, %p3351_p12 }
  0x60   :  { %3359 = shalt.err (!%p3356_p0)
}
  0x61   :  { %s3360_s28 = scalar_lea.vmem %s3775_s27, 256  ;;  %p3365_p2 = scmp.lt.s32.totalorder %s3775_s27, %s3775_s27 }
  0x62   :  { %p3361_p1 = scmp.ne.s32.totalorder %s3775_s27, %s3360_s28  ;;  %p3366_p3 = scmp.lt.s32.totalorder %s3360_s28, %s3360_s28 }
  0x64   :  { %p3367_p4 = por %p3366_p3, %p3365_p2 }
  0x66   :  { %p3368_p5 = pnand %p3367_p4, %p3361_p1 }
  0x68   :  { %3371 = shalt.err (!%p3368_p5)
}
  0x69   :  { %s3618_s9 = smov 128   ;;  %s3619_s25 = smov 8  }
  0x6a   :  { %163 = dma.hbm_to_vmem [thread:$0]  %s4705_s11, 256, %s3775_s27, [#allocation22], %s3618_s9, %s3618_s9, %s3619_s25  }
  0x6b   :  { %s3620_s18 = smov [#allocation3]   ;;  %s3621_s7 = smov [#allocation8]  }
  0x6c   :  { %s35_s20 = sshll.u32 %s3620_s18, 4  ;;  %s57_s16 = sshll.u32 %s3621_s7, 4  ;;  %s36_s20 = int_to_ptr.vmem [resolvable:$true] %s35_s20  ;;  %s3812_s16 = int_to_ptr.vmem [resolvable:$true] %s57_s16 }
  0x6d   :  { %s3372_s5 = scalar_lea.hbm %s4694_s0, 512 }
  0x6e   :  { %p3373_p6 = scmp.ne.s32.totalorder %s4694_s0, %s3372_s5  ;;  %p3376_p7 = scmp.lt.u32.totalorder %s3372_s5, %s4694_s0 }
  0x70   :  { %p3378_p8 = pnand %p3376_p7, %p3373_p6 }
  0x72   :  { %3381 = shalt.err (!%p3378_p8)
}
  0x73   :  { %s3382_s11 = scalar_lea.vmem %s36_s20, 512  ;;  %p3387_p10 = scmp.lt.s32.totalorder %s36_s20, %s36_s20 }
  0x74   :  { %p3383_p9 = scmp.ne.s32.totalorder %s36_s20, %s3382_s11  ;;  %p3388_p11 = scmp.lt.s32.totalorder %s3382_s11, %s3382_s11 }
  0x76   :  { %p3389_p12 = por %p3388_p11, %p3387_p10 }
  0x78   :  { %p3390_p13 = pnand %p3389_p12, %p3383_p9 }
  0x7a   :  { %3393 = shalt.err (!%p3390_p13)
}
  0x7b   :  { %41 = dma.hbm_to_vmem [thread:$0]  %s4694_s0, 512, %s36_s20, [#allocation4], %s3614_s21, %s3614_s21, %s3615_s26  }
  0x7c   :  { %s3394_s17 = scalar_lea.hbm %s4696_s2, 1024 }
  0x7d   :  { %p3395_p0 = scmp.ne.s32.totalorder %s4696_s2, %s3394_s17  ;;  %p3398_p1 = scmp.lt.u32.totalorder %s3394_s17, %s4696_s2 }
  0x7f   :  { %p3400_p2 = pnand %p3398_p1, %p3395_p0 }
  0x81   :  { %3403 = shalt.err (!%p3400_p2)
}
  0x82   :  { %s3404_s5 = scalar_lea.vmem %s3812_s16, 1024  ;;  %p3409_p4 = scmp.lt.s32.totalorder %s3812_s16, %s3812_s16 }
  0x83   :  { %p3405_p3 = scmp.ne.s32.totalorder %s3812_s16, %s3404_s5  ;;  %p3410_p5 = scmp.lt.s32.totalorder %s3404_s5, %s3404_s5 }
  0x85   :  { %p3411_p6 = por %p3410_p5, %p3409_p4 }
  0x87   :  { %p3412_p7 = pnand %p3411_p6, %p3405_p3 }
  0x89   :  { %3415 = shalt.err (!%p3412_p7)
}
  0x8a   :  { %63 = dma.hbm_to_vmem [thread:$0]  %s4696_s2, 1024, %s3812_s16, [#allocation7], %s3614_s21, %s3614_s21, %s3615_s26  }
  0x8b   :  { %s3622_s29 = smov [#allocation11]   ;;  %s3623_s3 = smov [#allocation14]  }
  0x8c   :  { %s79_s24 = sshll.u32 %s3622_s29, 4  ;;  %s104_s1 = sshll.u32 %s3623_s3, 4  ;;  %s80_s24 = int_to_ptr.vmem [resolvable:$true] %s79_s24  ;;  %s105_s1 = int_to_ptr.vmem [resolvable:$true] %s104_s1 }
  0x8d   :  { %s3416_s19 = scalar_lea.hbm %s4698_s4, 1024 }
  0x8e   :  { %p3417_p8 = scmp.ne.s32.totalorder %s4698_s4, %s3416_s19  ;;  %p3420_p9 = scmp.lt.u32.totalorder %s3416_s19, %s4698_s4 }
  0x90   :  { %p3422_p10 = pnand %p3420_p9, %p3417_p8 }
  0x92   :  { %3425 = shalt.err (!%p3422_p10)
}
  0x93   :  { %s3426_s2 = scalar_lea.vmem %s80_s24, 1024  ;;  %p3431_p12 = scmp.lt.s32.totalorder %s80_s24, %s80_s24 }
  0x94   :  { %p3427_p11 = scmp.ne.s32.totalorder %s80_s24, %s3426_s2  ;;  %p3432_p13 = scmp.lt.s32.totalorder %s3426_s2, %s3426_s2 }
  0x96   :  { %p3433_p0 = por %p3432_p13, %p3431_p12 }
  0x98   :  { %p3434_p1 = pnand %p3433_p0, %p3427_p11 }
  0x9a   :  { %3437 = shalt.err (!%p3434_p1)
}
  0x9b   :  { %85 = dma.hbm_to_vmem [thread:$0]  %s4698_s4, 1024, %s80_s24, [#allocation10], %s3614_s21, %s3614_s21, %s3615_s26  }
  0x9c   :  { %s3438_s5 = scalar_lea.hbm %s4700_s6, 16 }
  0x9d   :  { %p3439_p2 = scmp.ne.s32.totalorder %s4700_s6, %s3438_s5  ;;  %p3442_p3 = scmp.lt.u32.totalorder %s3438_s5, %s4700_s6 }
  0x9f   :  { %p3444_p4 = pnand %p3442_p3, %p3439_p2 }
  0xa1   :  { %3447 = shalt.err (!%p3444_p4)
}
  0xa2   :  { %s3448_s11 = scalar_lea.vmem %s105_s1, 16  ;;  %s3452_s27 = scalar_lea.vmem %s105_s1, 32 }
  0xa3   :  { %p3449_p5 = scmp.ne.s32.totalorder %s105_s1, %s3448_s11  ;;  %p3453_p6 = scmp.lt.s32.totalorder %s105_s1, %s105_s1 }
  0xa4   :  { %p3454_p7 = scmp.lt.s32.totalorder %s3452_s27, %s3448_s11 }
  0xa6   :  { %p3455_p8 = por %p3454_p7, %p3453_p6 }
  0xa8   :  { %p3456_p9 = pnand %p3455_p8, %p3449_p5 }
  0xaa   :  { %3459 = shalt.err (!%p3456_p9)
}
  0xab   :  { %107 = dma.hbm_to_vmem [thread:$0]  %s4700_s6, 16, %s105_s1, [#allocation13]  }
  0xac   :  { %s3624_s24 = smov [#allocation17]   ;;  %s3625_s28 = smov [#allocation20]  }
  0xad   :  { %s126_s19 = sshll.u32 %s3624_s24, 4  ;;  %s148_s30 = sshll.u32 %s3625_s28, 4  ;;  %s127_s19 = int_to_ptr.vmem [resolvable:$true] %s126_s19  ;;  %s149_s30 = int_to_ptr.vmem [resolvable:$true] %s148_s30 }
  0xae   :  { %s3460_s2 = scalar_lea.hbm %s4702_s8, 16 }
  0xaf   :  { %p3461_p10 = scmp.ne.s32.totalorder %s4702_s8, %s3460_s2  ;;  %p3464_p11 = scmp.lt.u32.totalorder %s3460_s2, %s4702_s8 }
  0xb1   :  { %p3466_p12 = pnand %p3464_p11, %p3461_p10 }
  0xb3   :  { %3469 = shalt.err (!%p3466_p12)
}
  0xb4   :  { %s3470_s6 = scalar_lea.vmem %s127_s19, 16  ;;  %s3474_s1 = scalar_lea.vmem %s127_s19, 32 }
  0xb5   :  { %p3471_p13 = scmp.ne.s32.totalorder %s127_s19, %s3470_s6  ;;  %p3475_p0 = scmp.lt.s32.totalorder %s127_s19, %s127_s19 }
  0xb6   :  { %p3476_p1 = scmp.lt.s32.totalorder %s3474_s1, %s3470_s6 }
  0xb8   :  { %p3477_p2 = por %p3476_p1, %p3475_p0 }
  0xba   :  { %p3478_p3 = pnand %p3477_p2, %p3471_p13 }
  0xbc   :  { %3481 = shalt.err (!%p3478_p3)
}
  0xbd   :  { %129 = dma.hbm_to_vmem [thread:$0]  %s4702_s8, 16, %s127_s19, [#allocation16]  }
  0xbe   :  { %s3482_s3 = scalar_lea.hbm %s4704_s10, 16 }
  0xbf   :  { %p3483_p4 = scmp.ne.s32.totalorder %s4704_s10, %s3482_s3  ;;  %p3486_p5 = scmp.lt.u32.totalorder %s3482_s3, %s4704_s10 }
  0xc1   :  { %p3488_p6 = pnand %p3486_p5, %p3483_p4 }
  0xc3   :  { %3491 = shalt.err (!%p3488_p6)
}
  0xc4   :  { %s3492_s24 = scalar_lea.vmem %s149_s30, 16  ;;  %s3496_s28 = scalar_lea.vmem %s149_s30, 32 }
  0xc5   :  { %p3493_p7 = scmp.ne.s32.totalorder %s149_s30, %s3492_s24  ;;  %p3497_p8 = scmp.lt.s32.totalorder %s149_s30, %s149_s30 }
  0xc6   :  { %p3498_p9 = scmp.lt.s32.totalorder %s3496_s28, %s3492_s24 }
  0xc8   :  { %p3499_p10 = por %p3498_p9, %p3497_p8 }
  0xca   :  { %p3500_p11 = pnand %p3499_p10, %p3493_p7 }
  0xcc   :  { %3503 = shalt.err (!%p3500_p11)
}
  0xcd   :  { %151 = dma.hbm_to_vmem [thread:$0]  %s4704_s10, 16, %s149_s30, [#allocation19]  }
  0xce   :  { %s3626_s17 = smov [#allocation23]   ;;  %s3504_s7 = scalar_lea.hbm %s4706_s12, 256 }
  0xcf   :  { %s169_s18 = sshll.u32 %s3626_s17, 4  ;;  %p3505_p12 = scmp.ne.s32.totalorder %s4706_s12, %s3504_s7  ;;  %s170_s18 = int_to_ptr.vmem [resolvable:$true] %s169_s18 }
  0xd0   :  { %p3508_p13 = scmp.lt.u32.totalorder %s3504_s7, %s4706_s12 }
  0xd2   :  { %p3510_p0 = pnand %p3508_p13, %p3505_p12 }
  0xd4   :  { %3513 = shalt.err (!%p3510_p0)
}
  0xd5   :  { %s3514_s5 = scalar_lea.vmem %s170_s18, 256  ;;  %p3519_p2 = scmp.lt.s32.totalorder %s170_s18, %s170_s18 }
  0xd6   :  { %p3515_p1 = scmp.ne.s32.totalorder %s170_s18, %s3514_s5  ;;  %p3520_p3 = scmp.lt.s32.totalorder %s3514_s5, %s3514_s5 }
  0xd8   :  { %p3521_p4 = por %p3520_p3, %p3519_p2 }
  0xda   :  { %p3522_p5 = pnand %p3521_p4, %p3515_p1 }
  0xdc   :  { %3525 = shalt.err (!%p3522_p5)
}
  0xdd   :  { %175 = dma.hbm_to_vmem [thread:$0]  %s4706_s12, 256, %s170_s18, [#allocation22], %s3618_s9, %s3618_s9, %s3619_s25  }
  0xde   :  { %3592 = dma.done.wait [#allocation4], 512  }
  0xdf   :  { %3593 = vsyncadd [#allocation4], 4294966784 }
  0xe0   :  { %3594 = dma.done.wait [#allocation7], 1088  }
  0xe1   :  { %3595 = vsyncadd [#allocation7], 4294966208 }
  0xe2   :  { %3596 = dma.done.wait [#allocation10], 1040  }
  0xe3   :  { %3597 = vsyncadd [#allocation10], 4294966256 }
  0xe4   :  { %3598 = dma.done.wait [#allocation13], 1040  }
  0xe5   :  { %3599 = vsyncadd [#allocation13], 4294966256 }
  0xe6   :  { %3600 = dma.done.wait [#allocation16], 1040  }
  0xe7   :  { %3601 = vsyncadd [#allocation16], 4294966256 }
  0xe8   :  { %3602 = dma.done.wait [#allocation19], 1040  }
  0xe9   :  { %3603 = vsyncadd [#allocation19], 4294966256 }
  0xea   :  { %3604 = dma.done.wait [#allocation22], 512  }
  0xeb   :  { %3605 = vsyncadd [#allocation22], 4294966784  ;;  %v3627_v0 = vmov 0.0   ;;  %vm3628_vm0 = vmmov 0   ;;  %v3918_v1 = vld [vmem:[#allocation8] sm:$0xff]   ;;  %v3921_v2 = vld [vmem:[#allocation8 + $0x8] sm:$0xff]   ;;  %v342_v31 = vlaneseq }
  0xec   :  { %2457 = vmatprep.subr.bf16.mxu1 %v3627_v0  ;;  %2473 = vmatprep.mubr.msk.bf16.mxu1 %vm3628_vm0, %v3627_v0  ;;  %vm265_vm1 = vcmask 1043456   ;;  %v3924_v3 = vld [vmem:[#allocation8 + $0x10] sm:$0xff]   ;;  %vm252_vm2 = vcmask 64512   ;;  %v224_v4 = vld [vmem:[#allocation6] sm:$0xf]  ;;  %v3050_v7 = vld [vmem:[#allocation3 + $0x8] sm:$0xff]  }
  0xed   :  { %2458 = vmatpush3.bf16.msra.mxu1 %v3918_v1  ;;  %3017 = vmatprep.subr.msk.bf16.mxu0 %vm265_vm1, %v224_v4  ;;  %v267_v5 = vsel %vm265_vm1, %v224_v4, 0  ;;  %v3048_v6 = vld [vmem:[#allocation3] sm:$0xff]   ;;  %v3941_v10 = vld [vmem:[#allocation8 + $0x28] sm:$0xff]   ;;  %v3947_v11 = vld [vmem:[#allocation8 + $0x30] sm:$0xff]   ;;  %v343_v34 = vand.u32 127, %v342_v31  ;;  %s3629_s12 = smov 32  }
  0xee   :  { %2459 = vmatprep.subr.bf16.mxu1 %v3627_v0  ;;  %2448 = vmatpush3.bf16.msra.mxu0 %v267_v5  ;;  %v3931_v8 = vld [vmem:[#allocation8 + $0x18] sm:$0xff]   ;;  %v3935_v9 = vld [vmem:[#allocation8 + $0x20] sm:$0xff]   ;;  %v347_v13 = vld [vmem:[#allocation21] sm:$0xff]  ;;  %s3630_s0 = smov 96  }
  0xef   :  { %2449 = vmatprep.mubr.msk.bf16.mxu0 %vm252_vm2, %v3048_v6  ;;  %2477 = vmatprep.subr.bf16.mxu0 %v3627_v0  ;;  %v3953_v12 = vld [vmem:[#allocation8 + $0x38] sm:$0xff]   ;;  %v350_v14 = vpack.c.bf16 %v347_v13, %v347_v13  ;;  %v3971_v15 = vld [vmem:[#allocation11] sm:$0xff]   ;;  %v3974_v16 = vld [vmem:[#allocation11 + $0x8] sm:$0xff]   ;;  %vm344_vm3 = vcmp.ge.s32.totalorder %v343_v34, 64  ;;  %vm345_vm4 = vcmp.lt.s32.totalorder %v343_v34, 96 }
  0xf0   :  { %v3978_v17 = vld [vmem:[#allocation11 + $0x10] sm:$0xff]   ;;  %v3989_v22 = vld [vmem:[#allocation9] ss:$0 sm:$0xff]  ;;  %v3996_v35 = vld [vmem:[#allocation11 + $0x20] sm:$0xff]  }
  0xf1   :  { %2460 = vmatpush3.bf16.msra.mxu1 %v3921_v2  ;;  %2450 = vmatmul.mubr.msk.bf16.vlgmr.msra.gmra.mrb[0].mxu0 %vm252_vm2, %v3050_v7  ;;  %v3992_v33 = vld [vmem:[#allocation11 + $0x18] sm:$0xff]   ;;  %v3057_v36 = vld [vmem:[#allocation3 + $0x10] sm:$0xff]   ;;  %vm4002_vm5 = vmand %vm344_vm3, %vm345_vm4 }
  0xf2   :  { %2461 = vmatprep.subr.bf16.mxu1 %v3627_v0  ;;  %2478 = vmatpush3.bf16.msra.mxu0 %v3918_v1  ;;  %v4000_v37 = vld [vmem:[#allocation11 + $0x28] sm:$0xff]   ;;  %v3059_v38 = vld [vmem:[#allocation3 + $0x18] sm:$0xff]   ;;  %v4028_v54 = vld [vmem:[#allocation12] sm:$0xff]  }
  0xf3   :  { %2479 = vmatprep.subr.bf16.mxu0 %v3627_v0  ;;  %2453 = vmatprep.mubr.msk.bf16.mxu0 %vm252_vm2, %v3057_v36  ;;  %v4009_v42 = vld [vmem:[#allocation11 + $0x30] sm:$0xff]   ;;  %v4019_v44 = vld [vmem:[#allocation11 + $0x38] sm:$0xff]   ;;  %v4031_v56 = vld [vmem:[#allocation12 + $0x8] sm:$0xff]  }
  0xf4   :  { %v352_v46 = vld [vmem:[#allocation23] sm:$0xff]  ;;  %v4053_v59 = vld [vmem:[#allocation12 + $0x20] sm:$0xff]   ;;  %v4059_v60 = vld [vmem:[#allocation12 + $0x28] sm:$0xff]  }
  0xf5   :  { %2462 = vmatpush3.bf16.msra.mxu1 %v3924_v3  ;;  %v4041_v57 = vld [vmem:[#allocation12 + $0x10] sm:$0xff]   ;;  %v4047_v58 = vld [vmem:[#allocation12 + $0x18] sm:$0xff]  }
  0xf6   :  { %2463 = vmatprep.subr.bf16.mxu1 %v3627_v0  ;;  %2480 = vmatpush3.bf16.msra.mxu0 %v3921_v2  ;;  %v4065_v61 = vld [vmem:[#allocation12 + $0x30] sm:$0xff]   ;;  %v4071_v62 = vld [vmem:[#allocation12 + $0x38] sm:$0xff]  }
  0xf7   :  { %2481 = vmatprep.subr.bf16.mxu0 %v3627_v0  ;;  %v349_v63 = vld [vmem:[#allocation21 + $0x8] sm:$0xff]  ;;  %v3081_v39 = vld [vmem:[#allocation18 + $0x18] sm:$0xff]  }
  0xf8   :  { %v351_v4 = vpack.c.bf16 %v349_v63, %v349_v63 }
  0xf9   :  { %2464 = vmatpush3.bf16.msra.mxu1 %v3931_v8  ;;  %2454 = vmatmul.mubr.msk.bf16.gmra.mrb[4].mxu0 %vm252_vm2, %v3059_v38 }
  0xfa   :  { %2465 = vmatprep.subr.bf16.mxu1 %v3627_v0  ;;  %2482 = vmatpush3.bf16.msra.mxu0 %v3924_v3 }
  0xfb   :  { %2483 = vmatprep.subr.bf16.mxu0 %v3627_v0  ;;  %2493 = vmatprep.mubr.msk.bf16.mxu0 %vm3628_vm0, %v3627_v0 }
  0xfd   :  { %2466 = vmatpush3.bf16.msra.mxu1 %v3935_v9 }
  0xfe   :  { %2467 = vmatprep.subr.bf16.mxu1 %v3627_v0  ;;  %2484 = vmatpush3.bf16.msra.mxu0 %v3931_v8 }
  0xff   :  { %2485 = vmatprep.subr.bf16.mxu0 %v3627_v0 }
 0x101   :  { %2468 = vmatpush3.bf16.msra.mxu1 %v3941_v10 }
 0x102   :  { %2469 = vmatprep.subr.bf16.mxu1 %v3627_v0  ;;  %2486 = vmatpush3.bf16.msra.mxu0 %v3935_v9 }
 0x103   :  { %2487 = vmatprep.subr.bf16.mxu0 %v3627_v0 }
 0x105   :  { %2470 = vmatpush3.bf16.msra.mxu1 %v3947_v11 }
 0x106   :  { %2471 = vmatprep.subr.bf16.mxu1 %v3627_v0  ;;  %2488 = vmatpush3.bf16.msra.mxu0 %v3941_v10 }
 0x107   :  { %2489 = vmatprep.subr.bf16.mxu0 %v3627_v0 }
 0x109   :  { %2472 = vmatpush3.bf16.msra.mxu1 %v3953_v12 }
 0x10a   :  { %2497 = vmatprep.subr.bf16.mxu1 %v3627_v0  ;;  %2490 = vmatpush3.bf16.msra.mxu0 %v3947_v11 }
 0x10b   :  { %2491 = vmatprep.subr.bf16.mxu0 %v3627_v0 }
 0x10c   :  { %2474 = vmatmul.mubr.bf16.vlgmr.msra.gmra.mrb[0].mxu1 %v350_v14 }
 0x10d   :  { %2513 = vmatprep.mubr.msk.bf16.mxu1 %vm3628_vm0, %v3627_v0  ;;  %2498 = vmatpush3.bf16.msra.mxu1 %v3971_v15 }
 0x10e   :  { %2492 = vmatpush3.bf16.msra.mxu0 %v3953_v12  ;;  %2499 = vmatprep.subr.bf16.mxu1 %v3627_v0 }
 0x10f   :  { %2537 = vmatprep.subr.bf16.mxu0 %v3627_v0 }
 0x111   :  { %2500 = vmatpush3.bf16.msra.mxu1 %v3974_v16 }
 0x112   :  { %2501 = vmatprep.subr.bf16.mxu1 %v3627_v0 }
 0x115   :  { %2502 = vmatpush3.bf16.msra.mxu1 %v3978_v17 }
 0x116   :  { %2503 = vmatprep.subr.bf16.mxu1 %v3627_v0 }
 0x119   :  { %2504 = vmatpush3.bf16.msra.mxu1 %v3992_v33 }
 0x11a   :  { %2505 = vmatprep.subr.bf16.mxu1 %v3627_v0 }
 0x11d   :  { %2506 = vmatpush3.bf16.msra.mxu1 %v3996_v35 }
 0x11e   :  { %2507 = vmatprep.subr.bf16.mxu1 %v3627_v0 }
 0x121   :  { %2508 = vmatpush3.bf16.msra.mxu1 %v4000_v37 }
 0x122   :  { %2509 = vmatprep.subr.bf16.mxu1 %v3627_v0 }
 0x125   :  { %2510 = vmatpush3.bf16.msra.mxu1 %v4009_v42 }
 0x126   :  { %2511 = vmatprep.subr.bf16.mxu1 %v3627_v0 }
 0x129   :  { %2512 = vmatpush3.bf16.msra.mxu1 %v4019_v44 }
 0x12a   :  { %2517 = vmatprep.subr.bf16.mxu1 %v3627_v0 }
 0x1c4   :  { %v3983_v18 = vpop.f32.mrb[0].mxu0 }
 0x1c5   :  { %v303_v19 = vpop.f32.mrb[1].mxu0 }
 0x1c6   :  { %v3985_v20 = vpop.f32.mrb[2].mxu0  ;;  %v304_v23 = vadd.f32 %v3989_v22, %v303_v19 }
 0x1c7   :  { %v3987_v21 = vpop.f32.mrb[3].mxu0 }
 0x1c8   :  { %v307_v14 = vadd.f32 %v3989_v22, %v3987_v21  ;;  %v4112_v21 = vld [vmem:[#allocation14] ss:$0 sm:$0xff] }
 0x1cc   :  { %v4098_v5 = vpop.f32.mrb[4].mxu0 }
 0x1cd   :  { %v4100_v6 = vpop.f32.mrb[5].mxu0 }
 0x1ce   :  { %v4102_v7 = vpop.f32.mrb[6].mxu0 }
 0x1cf   :  { %v4104_v13 = vpop.f32.mrb[7].mxu0 }
 0x1df   :  { %v454_v24 = vpop.f32.mrb[0].mxu1 }
 0x1e0   :  { %v460_v25 = vadd.f32 %v454_v24, %v304_v23  ;;  %v2475_v26 = vpop.f32.mrb[1].mxu1 }
 0x1e1   :  { %v457_v27 = vpop.f32.mrb[2].mxu1 }
 0x1e2   :  { %v2157_v28 = vmul.f32 -1.442695, %v460_v25  ;;  %v2476_v29 = vpop.f32.mrb[3].mxu1 }
 0x1e4   :  { %3086 = vpow2.f32 %v2157_v28 }
 0x1e5   :  { %3088 = vtanh.f32 %v460_v25 }
 0x1ee   :  { %v3087_v30 = vpop.eup %3086 }
 0x1ef   :  { %v465_v32 = vadd.f32 1.0, %v3087_v30  ;;  %v3089_v40 = vpop.eup %3088 }
 0x1f1   :  { %3090 = vrcp.f32 %v465_v32 }
 0x1fb   :  { %v3091_v41 = vpop.eup %3090 }
 0x1fc   :  { %v468_v43 = vsel %vm4002_vm5, %v3089_v40, %v3091_v41 }
 0x1fd   :  { %473 = vrot.lane.b32.xlu1 %v468_v43, %s3629_s12  ;;  %469 = vrot.lane.b32.xlu0 %v468_v43, %s3630_s0 }
 0x201   :  { %471 = vrot.lane.b32.xlu0 %v468_v43, %s3614_s21 }
 0x26f   :  { %v470_v45 = vpop.permute.xlu0 %469  ;;  %v474_v52 = vpop.permute.xlu1 %473 }
 0x270   :  { %v475_v48 = vmul.f32 %v470_v45, %v352_v46 }
 0x273   :  { %v472_v47 = vpop.permute.xlu0 %471 }
 0x274   :  { %v476_v49 = vmul.f32 %v472_v47, %v468_v43 }
 0x276   :  { %v4025_v50 = vadd.f32 %v476_v49, %v475_v48 }
 0x278   :  { %3092 = vtanh.f32 %v4025_v50 }
 0x282   :  { %v3093_v51 = vpop.eup %3092 }
 0x283   :  { %v479_v53 = vmul.f32 %v3093_v51, %v474_v52 }
 0x285   :  { %v480_v55 = vpack.c.bf16 %v479_v53, %v479_v53 }
 0x287   :  { %2494 = vmatmul.mubr.bf16.vlgmr.msra.gmra.mrb[8].mxu0 %v480_v55  ;;  %2514 = vmatmul.mubr.bf16.vlgmr.msra.gmra.mrb[4].mxu1 %v480_v55 }
 0x288   :  { %2518 = vmatpush3.bf16.msra.mxu1 %v4028_v54  ;;  %2533 = vmatprep.mubr.msk.bf16.mxu1 %vm3628_vm0, %v3627_v0 }
 0x289   :  { %2519 = vmatprep.subr.bf16.mxu1 %v3627_v0  ;;  %2538 = vmatpush3.bf16.msra.mxu0 %v3918_v1 }
 0x28a   :  { %2539 = vmatprep.subr.bf16.mxu0 %v3627_v0  ;;  %2553 = vmatprep.mubr.msk.bf16.mxu0 %vm3628_vm0, %v3627_v0 }
 0x28c   :  { %2520 = vmatpush3.bf16.msra.mxu1 %v4031_v56 }
 0x28d   :  { %2521 = vmatprep.subr.bf16.mxu1 %v3627_v0  ;;  %2540 = vmatpush3.bf16.msra.mxu0 %v3921_v2 }
 0x28e   :  { %2541 = vmatprep.subr.bf16.mxu0 %v3627_v0 }
 0x290   :  { %2522 = vmatpush3.bf16.msra.mxu1 %v4041_v57 }
 0x291   :  { %2523 = vmatprep.subr.bf16.mxu1 %v3627_v0  ;;  %2542 = vmatpush3.bf16.msra.mxu0 %v3924_v3 }
 0x292   :  { %2543 = vmatprep.subr.bf16.mxu0 %v3627_v0 }
 0x294   :  { %2524 = vmatpush3.bf16.msra.mxu1 %v4047_v58 }
 0x295   :  { %2525 = vmatprep.subr.bf16.mxu1 %v3627_v0  ;;  %2544 = vmatpush3.bf16.msra.mxu0 %v3931_v8 }
 0x296   :  { %2545 = vmatprep.subr.bf16.mxu0 %v3627_v0 }
 0x298   :  { %2526 = vmatpush3.bf16.msra.mxu1 %v4053_v59 }
 0x299   :  { %2527 = vmatprep.subr.bf16.mxu1 %v3627_v0  ;;  %2546 = vmatpush3.bf16.msra.mxu0 %v3935_v9 }
 0x29a   :  { %2547 = vmatprep.subr.bf16.mxu0 %v3627_v0 }
 0x29c   :  { %2528 = vmatpush3.bf16.msra.mxu1 %v4059_v60 }
 0x29d   :  { %2529 = vmatprep.subr.bf16.mxu1 %v3627_v0  ;;  %2548 = vmatpush3.bf16.msra.mxu0 %v3941_v10 }
 0x29e   :  { %2549 = vmatprep.subr.bf16.mxu0 %v3627_v0 }
 0x2a0   :  { %2530 = vmatpush3.bf16.msra.mxu1 %v4065_v61 }
 0x2a1   :  { %2531 = vmatprep.subr.bf16.mxu1 %v3627_v0  ;;  %2550 = vmatpush3.bf16.msra.mxu0 %v3947_v11 }
 0x2a2   :  { %2551 = vmatprep.subr.bf16.mxu0 %v3627_v0 }
 0x2a4   :  { %2532 = vmatpush3.bf16.msra.mxu1 %v4071_v62 }
 0x2a5   :  { %2552 = vmatpush3.bf16.msra.mxu0 %v3953_v12  ;;  %2597 = vmatprep.subr.bf16.mxu1 %v3627_v0 }
 0x2a6   :  { %2557 = vmatprep.subr.bf16.mxu0 %v3627_v0 }
 0x2a7   :  { %2534 = vmatmul.mubr.bf16.vlgmr.msra.gmra.mrb[4].mxu1 %v351_v4 }
 0x2a8   :  { %2598 = vmatpush3.bf16.msra.mxu1 %v3918_v1  ;;  %2613 = vmatprep.mubr.msk.bf16.mxu1 %vm3628_vm0, %v3627_v0 }
 0x2a9   :  { %2599 = vmatprep.subr.bf16.mxu1 %v3627_v0 }
 0x2ac   :  { %2600 = vmatpush3.bf16.msra.mxu1 %v3921_v2 }
 0x2ad   :  { %2601 = vmatprep.subr.bf16.mxu1 %v3627_v0 }
 0x2b0   :  { %2602 = vmatpush3.bf16.msra.mxu1 %v3924_v3 }
 0x2b1   :  { %2603 = vmatprep.subr.bf16.mxu1 %v3627_v0 }
 0x2b4   :  { %2604 = vmatpush3.bf16.msra.mxu1 %v3931_v8 }
 0x2b5   :  { %2605 = vmatprep.subr.bf16.mxu1 %v3627_v0 }
 0x2b8   :  { %2606 = vmatpush3.bf16.msra.mxu1 %v3935_v9 }
 0x2b9   :  { %2607 = vmatprep.subr.bf16.mxu1 %v3627_v0 }
 0x2bc   :  { %2608 = vmatpush3.bf16.msra.mxu1 %v3941_v10 }
 0x2bd   :  { %2609 = vmatprep.subr.bf16.mxu1 %v3627_v0 }
 0x2c0   :  { %2610 = vmatpush3.bf16.msra.mxu1 %v3947_v11 }
 0x2c1   :  { %2611 = vmatprep.subr.bf16.mxu1 %v3627_v0 }
 0x2c4   :  { %2612 = vmatpush3.bf16.msra.mxu1 %v3953_v12 }
 0x2c5   :  { %2617 = vmatprep.subr.bf16.mxu1 %v3627_v0 }
 0x35a   :  { %v516_v19 = vpop.f32.mrb[8].mxu0 }
 0x35b   :  { %v522_v23 = vadd.f32 %v516_v19, %v307_v14  ;;  %v2495_v24 = vpop.f32.mrb[9].mxu0 }
 0x35c   :  { %v519_v25 = vpop.f32.mrb[10].mxu0 }
 0x35d   :  { %v2158_v26 = vmul.f32 -1.442695, %v522_v23  ;;  %v2496_v27 = vpop.f32.mrb[11].mxu0 }
 0x35f   :  { %3094 = vpow2.f32 %v2158_v26 }
 0x360   :  { %3096 = vtanh.f32 %v522_v23 }
 0x369   :  { %v3095_v28 = vpop.eup %3094 }
 0x36a   :  { %v527_v29 = vadd.f32 1.0, %v3095_v28  ;;  %v3097_v30 = vpop.eup %3096 }
 0x36c   :  { %3098 = vrcp.f32 %v527_v29 }
 0x376   :  { %v3099_v31 = vpop.eup %3098 }
 0x377   :  { %v530_v32 = vsel %vm4002_vm5, %v3097_v30, %v3099_v31 }
 0x378   :  { %533 = vrot.lane.b32.xlu0 %v530_v32, %s3614_s21  ;;  %531 = vrot.lane.b32.xlu1 %v530_v32, %s3630_s0 }
 0x37a   :  { %v752_v34 = vpop.f32.mrb[4].mxu1 }
 0x37b   :  { %v2977_v36 = vadd.f32 %v4112_v21, %v752_v34  ;;  %v2535_v38 = vpop.f32.mrb[5].mxu1  ;;  %v312_v34 = vadd.f32 %v3983_v18, %v3989_v22 }
 0x37c   :  { %v755_v40 = vpop.f32.mrb[6].mxu1  ;;  %535 = vrot.lane.b32.xlu1 %v530_v32, %s3629_s12 }
 0x37d   :  { %v2176_v41 = vmul.f32 -1.442695, %v2977_v36  ;;  %v2536_v43 = vpop.f32.mrb[7].mxu1 }
 0x37f   :  { %3100 = vpow2.f32 %v2176_v41 }
 0x380   :  { %3102 = vtanh.f32 %v2977_v36 }
 0x389   :  { %v3101_v45 = vpop.eup %3100 }
 0x38a   :  { %v763_v46 = vadd.f32 1.0, %v3101_v45  ;;  %v3103_v47 = vpop.eup %3102 }
 0x38c   :  { %3104 = vrcp.f32 %v763_v46 }
 0x396   :  { %v3105_v48 = vpop.eup %3104 }
 0x397   :  { %v766_v49 = vsel %vm4002_vm5, %v3103_v47, %v3105_v48 }
 0x398   :  { %767 = vrot.lane.b32.xlu0 %v766_v49, %s3630_s0  ;;  %769 = vrot.lane.b32.xlu1 %v766_v49, %s3614_s21 }
 0x39c   :  { %771 = vrot.lane.b32.xlu0 %v766_v49, %s3629_s12 }
 0x3ea   :  { %v534_v51 = vpop.permute.xlu0 %533  ;;  %v532_v52 = vpop.permute.xlu1 %531 }
 0x3eb   :  { %v538_v53 = vmul.f32 %v534_v51, %v530_v32  ;;  %v537_v55 = vmul.f32 %v532_v52, %v4025_v50  ;;  %v354_v50 = vld [vmem:[#allocation23 + $0x8] sm:$0xff] }
 0x3ed   :  { %v4122_v63 = vadd.f32 %v538_v53, %v537_v55 }
 0x3ee   :  { %v536_v14 = vpop.permute.xlu1 %535 }
 0x3ef   :  { %3106 = vtanh.f32 %v4122_v63 }
 0x3f9   :  { %v3107_v4 = vpop.eup %3106 }
 0x3fa   :  { %v541_v19 = vmul.f32 %v3107_v4, %v536_v14 }
 0x3fc   :  { %v542_v23 = vpack.c.bf16 %v541_v19, %v541_v19 }
 0x3fe   :  { %2554 = vmatmul.mubr.bf16.vlgmr.msra.gmra.mrb[12].mxu0 %v542_v23 }
 0x3ff   :  { %2558 = vmatpush3.bf16.msra.mxu0 %v3971_v15  ;;  %2573 = vmatprep.mubr.msk.bf16.mxu0 %vm3628_vm0, %v3627_v0 }
 0x400   :  { %2559 = vmatprep.subr.bf16.mxu0 %v3627_v0 }
 0x403   :  { %2560 = vmatpush3.bf16.msra.mxu0 %v3974_v16 }
 0x404   :  { %2561 = vmatprep.subr.bf16.mxu0 %v3627_v0 }
 0x407   :  { %2562 = vmatpush3.bf16.msra.mxu0 %v3978_v17 }
 0x408   :  { %2563 = vmatprep.subr.bf16.mxu0 %v3627_v0 }
 0x40a   :  { %v768_v24 = vpop.permute.xlu0 %767  ;;  %v770_v25 = vpop.permute.xlu1 %769 }
 0x40b   :  { %2564 = vmatpush3.bf16.msra.mxu0 %v3992_v33  ;;  %v773_v26 = vmul.f32 %v768_v24, %v354_v50  ;;  %v774_v27 = vmul.f32 %v770_v25, %v766_v49 }
 0x40c   :  { %2565 = vmatprep.subr.bf16.mxu0 %v3627_v0 }
 0x40d   :  { %v4149_v28 = vadd.f32 %v774_v27, %v773_v26 }
 0x40e   :  { %v772_v30 = vpop.permute.xlu0 %771 }
 0x40f   :  { %2566 = vmatpush3.bf16.msra.mxu0 %v3996_v35  ;;  %3108 = vtanh.f32 %v4149_v28 }
 0x410   :  { %2567 = vmatprep.subr.bf16.mxu0 %v3627_v0 }
 0x413   :  { %2568 = vmatpush3.bf16.msra.mxu0 %v4000_v37 }
 0x414   :  { %2569 = vmatprep.subr.bf16.mxu0 %v3627_v0 }
 0x417   :  { %2570 = vmatpush3.bf16.msra.mxu0 %v4009_v42 }
 0x418   :  { %2571 = vmatprep.subr.bf16.mxu0 %v3627_v0 }
 0x419   :  { %v3109_v29 = vpop.eup %3108 }
 0x41a   :  { %v777_v31 = vmul.f32 %v3109_v29, %v772_v30 }
 0x41b   :  { %2572 = vmatpush3.bf16.msra.mxu0 %v4019_v44 }
 0x41c   :  { %2577 = vmatprep.subr.bf16.mxu0 %v3627_v0  ;;  %v778_v32 = vpack.c.bf16 %v777_v31, %v777_v31 }
 0x41e   :  { %2574 = vmatmul.mubr.bf16.vlgmr.msra.gmra.mrb[16].mxu0 %v542_v23 }
 0x41f   :  { %2578 = vmatpush3.bf16.msra.mxu0 %v4028_v54  ;;  %2593 = vmatprep.mubr.msk.bf16.mxu0 %vm3628_vm0, %v3627_v0 }
 0x420   :  { %2579 = vmatprep.subr.bf16.mxu0 %v3627_v0 }
 0x423   :  { %2580 = vmatpush3.bf16.msra.mxu0 %v4031_v56 }
 0x424   :  { %2581 = vmatprep.subr.bf16.mxu0 %v3627_v0 }
 0x427   :  { %2582 = vmatpush3.bf16.msra.mxu0 %v4041_v57 }
 0x428   :  { %2583 = vmatprep.subr.bf16.mxu0 %v3627_v0 }
 0x42b   :  { %2584 = vmatpush3.bf16.msra.mxu0 %v4047_v58 }
 0x42c   :  { %2585 = vmatprep.subr.bf16.mxu0 %v3627_v0 }
 0x42f   :  { %2586 = vmatpush3.bf16.msra.mxu0 %v4053_v59 }
 0x430   :  { %2587 = vmatprep.subr.bf16.mxu0 %v3627_v0 }
 0x433   :  { %2588 = vmatpush3.bf16.msra.mxu0 %v4059_v60 }
 0x434   :  { %2589 = vmatprep.subr.bf16.mxu0 %v3627_v0 }
 0x437   :  { %2590 = vmatpush3.bf16.msra.mxu0 %v4065_v61 }
 0x438   :  { %2591 = vmatprep.subr.bf16.mxu0 %v3627_v0 }
 0x43b   :  { %2592 = vmatpush3.bf16.msra.mxu0 %v4071_v62 }
 0x43c   :  { %2657 = vmatprep.subr.bf16.mxu0 %v3627_v0 }
 0x43e   :  { %2594 = vmatmul.mubr.bf16.vlgmr.msra.gmra.mrb[16].mxu0 %v778_v32 }
 0x43f   :  { %2658 = vmatpush3.bf16.msra.mxu0 %v3918_v1  ;;  %2673 = vmatprep.mubr.msk.bf16.mxu0 %vm3628_vm0, %v3627_v0 }
 0x440   :  { %2659 = vmatprep.subr.bf16.mxu0 %v3627_v0 }
 0x443   :  { %2660 = vmatpush3.bf16.msra.mxu0 %v3921_v2 }
 0x444   :  { %2661 = vmatprep.subr.bf16.mxu0 %v3627_v0 }
 0x447   :  { %2662 = vmatpush3.bf16.msra.mxu0 %v3924_v3 }
 0x448   :  { %2663 = vmatprep.subr.bf16.mxu0 %v3627_v0 }
 0x44b   :  { %2664 = vmatpush3.bf16.msra.mxu0 %v3931_v8 }
 0x44c   :  { %2665 = vmatprep.subr.bf16.mxu0 %v3627_v0 }
 0x44f   :  { %2666 = vmatpush3.bf16.msra.mxu0 %v3935_v9 }
 0x450   :  { %2667 = vmatprep.subr.bf16.mxu0 %v3627_v0 }
 0x453   :  { %2668 = vmatpush3.bf16.msra.mxu0 %v3941_v10 }
 0x454   :  { %2669 = vmatprep.subr.bf16.mxu0 %v3627_v0 }
 0x457   :  { %2670 = vmatpush3.bf16.msra.mxu0 %v3947_v11 }
 0x458   :  { %2671 = vmatprep.subr.bf16.mxu0 %v3627_v0 }
 0x45b   :  { %2672 = vmatpush3.bf16.msra.mxu0 %v3953_v12 }
 0x45c   :  { %2677 = vmatprep.subr.bf16.mxu0 %v3627_v0 }
 0x4d1   :  { %v814_v36 = vpop.f32.mrb[12].mxu0 }
 0x4d2   :  { %v820_v38 = vadd.f32 %v814_v36, %v312_v34  ;;  %v2555_v40 = vpop.f32.mrb[13].mxu0 }
 0x4d3   :  { %v817_v41 = vpop.f32.mrb[14].mxu0 }
 0x4d4   :  { %v2177_v43 = vmul.f32 -1.442695, %v820_v38  ;;  %v2556_v45 = vpop.f32.mrb[15].mxu0 }
 0x4d6   :  { %3110 = vpow2.f32 %v2177_v43 }
 0x4d7   :  { %3112 = vtanh.f32 %v820_v38 }
 0x4e0   :  { %v3111_v46 = vpop.eup %3110 }
 0x4e1   :  { %v825_v47 = vadd.f32 1.0, %v3111_v46  ;;  %v3113_v48 = vpop.eup %3112 }
 0x4e3   :  { %3114 = vrcp.f32 %v825_v47 }
 0x4ed   :  { %v3115_v49 = vpop.eup %3114 }
 0x4ee   :  { %v828_v51 = vsel %vm4002_vm5, %v3113_v48, %v3115_v49 }
 0x4ef   :  { %831 = vrot.lane.b32.xlu0 %v828_v51, %s3614_s21  ;;  %829 = vrot.lane.b32.xlu1 %v828_v51, %s3630_s0 }
 0x4f3   :  { %833 = vrot.lane.b32.xlu1 %v828_v51, %s3629_s12 }
 0x511   :  { %v915_v18 = vpop.f32.mrb[16].mxu0 }
 0x512   :  { %v2978_v52 = vadd.f32 %v4112_v21, %v915_v18  ;;  %v2595_v53 = vpop.f32.mrb[17].mxu0 }
 0x513   :  { %v918_v55 = vpop.f32.mrb[18].mxu0 }
 0x514   :  { %v2178_v4 = vmul.f32 -1.442695, %v2978_v52  ;;  %v2596_v14 = vpop.f32.mrb[19].mxu0 }
 0x516   :  { %3116 = vpow2.f32 %v2178_v4 }
 0x517   :  { %3118 = vtanh.f32 %v2978_v52 }
 0x520   :  { %v3117_v19 = vpop.eup %3116 }
 0x521   :  { %v926_v23 = vadd.f32 1.0, %v3117_v19  ;;  %v3119_v50 = vpop.eup %3118 }
 0x523   :  { %3120 = vrcp.f32 %v926_v23 }
 0x52d   :  { %v3121_v24 = vpop.eup %3120 }
 0x52e   :  { %v929_v25 = vsel %vm4002_vm5, %v3119_v50, %v3121_v24 }
 0x52f   :  { %932 = vrot.lane.b32.xlu1 %v929_v25, %s3614_s21  ;;  %930 = vrot.lane.b32.xlu0 %v929_v25, %s3630_s0 }
 0x533   :  { %934 = vrot.lane.b32.xlu0 %v929_v25, %s3629_s12 }
 0x561   :  { %v832_v26 = vpop.permute.xlu0 %831  ;;  %v830_v27 = vpop.permute.xlu1 %829 }
 0x562   :  { %v836_v29 = vmul.f32 %v832_v26, %v828_v51  ;;  %v835_v30 = vmul.f32 %v830_v27, %v4122_v63 }
 0x564   :  { %v4196_v31 = vadd.f32 %v836_v29, %v835_v30 }
 0x565   :  { %v834_v34 = vpop.permute.xlu1 %833 }
 0x566   :  { %3122 = vtanh.f32 %v4196_v31 }
 0x570   :  { %v3123_v32 = vpop.eup %3122 }
 0x571   :  { %v839_v36 = vmul.f32 %v3123_v32, %v834_v34 }
 0x573   :  { %v840_v38 = vpack.c.bf16 %v839_v36, %v839_v36 }
 0x575   :  { %2614 = vmatmul.mubr.bf16.vlgmr.msra.gmra.mrb[8].mxu1 %v840_v38 }
 0x576   :  { %2618 = vmatpush3.bf16.msra.mxu1 %v3971_v15  ;;  %2633 = vmatprep.mubr.msk.bf16.mxu1 %vm3628_vm0, %v3627_v0 }
 0x577   :  { %2619 = vmatprep.subr.bf16.mxu1 %v3627_v0 }
 0x57a   :  { %2620 = vmatpush3.bf16.msra.mxu1 %v3974_v16 }
 0x57b   :  { %2621 = vmatprep.subr.bf16.mxu1 %v3627_v0 }
 0x57e   :  { %2622 = vmatpush3.bf16.msra.mxu1 %v3978_v17 }
 0x57f   :  { %2623 = vmatprep.subr.bf16.mxu1 %v3627_v0 }
 0x582   :  { %2624 = vmatpush3.bf16.msra.mxu1 %v3992_v33 }
 0x583   :  { %2625 = vmatprep.subr.bf16.mxu1 %v3627_v0 }
 0x586   :  { %2626 = vmatpush3.bf16.msra.mxu1 %v3996_v35 }
 0x587   :  { %2627 = vmatprep.subr.bf16.mxu1 %v3627_v0 }
 0x58a   :  { %2628 = vmatpush3.bf16.msra.mxu1 %v4000_v37 }
 0x58b   :  { %2629 = vmatprep.subr.bf16.mxu1 %v3627_v0 }
 0x58e   :  { %2630 = vmatpush3.bf16.msra.mxu1 %v4009_v42 }
 0x58f   :  { %2631 = vmatprep.subr.bf16.mxu1 %v3627_v0 }
 0x592   :  { %2632 = vmatpush3.bf16.msra.mxu1 %v4019_v44 }
 0x593   :  { %2637 = vmatprep.subr.bf16.mxu1 %v3627_v0 }
 0x595   :  { %2634 = vmatmul.mubr.bf16.vlgmr.msra.gmra.mrb[12].mxu1 %v840_v38 }
 0x596   :  { %2638 = vmatpush3.bf16.msra.mxu1 %v4028_v54  ;;  %2653 = vmatprep.mubr.msk.bf16.mxu1 %vm3628_vm0, %v3627_v0 }
 0x597   :  { %2639 = vmatprep.subr.bf16.mxu1 %v3627_v0 }
 0x59a   :  { %2640 = vmatpush3.bf16.msra.mxu1 %v4031_v56 }
 0x59b   :  { %2641 = vmatprep.subr.bf16.mxu1 %v3627_v0 }
 0x59e   :  { %2642 = vmatpush3.bf16.msra.mxu1 %v4041_v57 }
 0x59f   :  { %2643 = vmatprep.subr.bf16.mxu1 %v3627_v0 }
 0x5a1   :  { %v933_v63 = vpop.permute.xlu1 %932  ;;  %v931_v40 = vpop.permute.xlu0 %930 }
 0x5a2   :  { %v937_v41 = vmul.f32 %v933_v63, %v929_v25  ;;  %v936_v43 = vmul.f32 %v931_v40, %v4149_v28  ;;  %2644 = vmatpush3.bf16.msra.mxu1 %v4047_v58 }
 0x5a3   :  { %2645 = vmatprep.subr.bf16.mxu1 %v3627_v0 }
 0x5a4   :  { %v4228_v45 = vadd.f32 %v937_v41, %v936_v43 }
 0x5a5   :  { %v935_v46 = vpop.permute.xlu0 %934 }
 0x5a6   :  { %3124 = vtanh.f32 %v4228_v45  ;;  %2646 = vmatpush3.bf16.msra.mxu1 %v4053_v59 }
 0x5a7   :  { %2647 = vmatprep.subr.bf16.mxu1 %v3627_v0 }
 0x5aa   :  { %2648 = vmatpush3.bf16.msra.mxu1 %v4059_v60 }
 0x5ab   :  { %2649 = vmatprep.subr.bf16.mxu1 %v3627_v0 }
 0x5ae   :  { %2650 = vmatpush3.bf16.msra.mxu1 %v4065_v61 }
 0x5af   :  { %2651 = vmatprep.subr.bf16.mxu1 %v3627_v0 }
 0x5b0   :  { %v3125_v28 = vpop.eup %3124 }
 0x5b1   :  { %v940_v47 = vmul.f32 %v3125_v28, %v935_v46 }
 0x5b2   :  { %2652 = vmatpush3.bf16.msra.mxu1 %v4071_v62 }
 0x5b3   :  { %v941_v48 = vpack.c.bf16 %v940_v47, %v940_v47  ;;  %2717 = vmatprep.subr.bf16.mxu1 %v3627_v0  ;;  %v4314_v47 = vld [vmem:[#allocation8] sm:$0xff]  }
 0x5b5   :  { %2654 = vmatmul.mubr.bf16.vlgmr.msra.gmra.mrb[12].mxu1 %v941_v48  ;;  %v4320_v48 = vld [vmem:[#allocation8 + $0x8] sm:$0xff]  }
 0x5b6   :  { %2718 = vmatpush3.bf16.msra.mxu1 %v3918_v1  ;;  %2733 = vmatprep.mubr.msk.bf16.mxu1 %vm3628_vm0, %v3627_v0  ;;  %v315_v1 = vadd.f32 %v3985_v20, %v3989_v22 }
 0x5b7   :  { %2719 = vmatprep.subr.bf16.mxu1 %v3627_v0 }
 0x5ba   :  { %2720 = vmatpush3.bf16.msra.mxu1 %v3921_v2 }
 0x5bb   :  { %2721 = vmatprep.subr.bf16.mxu1 %v3627_v0 }
 0x5be   :  { %2722 = vmatpush3.bf16.msra.mxu1 %v3924_v3 }
 0x5bf   :  { %2723 = vmatprep.subr.bf16.mxu1 %v3627_v0 }
 0x5c2   :  { %2724 = vmatpush3.bf16.msra.mxu1 %v3931_v8 }
 0x5c3   :  { %2725 = vmatprep.subr.bf16.mxu1 %v3627_v0 }
 0x5c6   :  { %2726 = vmatpush3.bf16.msra.mxu1 %v3935_v9 }
 0x5c7   :  { %2727 = vmatprep.subr.bf16.mxu1 %v3627_v0 }
 0x5ca   :  { %2728 = vmatpush3.bf16.msra.mxu1 %v3941_v10 }
 0x5cb   :  { %2729 = vmatprep.subr.bf16.mxu1 %v3627_v0 }
 0x5ce   :  { %2730 = vmatpush3.bf16.msra.mxu1 %v3947_v11 }
 0x5cf   :  { %2731 = vmatprep.subr.bf16.mxu1 %v3627_v0 }
 0x5d2   :  { %2732 = vmatpush3.bf16.msra.mxu1 %v3953_v12 }
 0x5d3   :  { %2737 = vmatprep.subr.bf16.mxu1 %v3627_v0 }
 0x648   :  { %v977_v2 = vpop.f32.mrb[8].mxu1 }
 0x649   :  { %v983_v3 = vadd.f32 %v977_v2, %v315_v1  ;;  %v2615_v8 = vpop.f32.mrb[9].mxu1  ;;  %v4324_v1 = vld [vmem:[#allocation8 + $0x10] sm:$0xff]   ;;  %v4328_v2 = vld [vmem:[#allocation8 + $0x18] sm:$0xff]  }
 0x64a   :  { %v980_v9 = vpop.f32.mrb[10].mxu1  ;;  %v4336_v8 = vld [vmem:[#allocation8 + $0x28] sm:$0xff]  }
 0x64b   :  { %v2179_v49 = vmul.f32 -1.442695, %v983_v3  ;;  %v2616_v51 = vpop.f32.mrb[11].mxu1  ;;  %v4340_v9 = vld [vmem:[#allocation8 + $0x30] sm:$0xff]  }
 0x64c   :  { %v320_v51 = vadd.f32 %v3989_v22, %v4100_v6 }
 0x64d   :  { %3126 = vpow2.f32 %v2179_v49  ;;  %v4344_v49 = vld [vmem:[#allocation8 + $0x38] sm:$0xff]  }
 0x64e   :  { %3128 = vtanh.f32 %v983_v3  ;;  %v4332_v3 = vld [vmem:[#allocation8 + $0x20] sm:$0xff]  }
 0x657   :  { %v3127_v10 = vpop.eup %3126 }
 0x658   :  { %v988_v18 = vadd.f32 1.0, %v3127_v10  ;;  %v3129_v11 = vpop.eup %3128 }
 0x65a   :  { %3130 = vrcp.f32 %v988_v18 }
 0x664   :  { %v3131_v52 = vpop.eup %3130 }
 0x665   :  { %v991_v12 = vsel %vm4002_vm5, %v3129_v11, %v3131_v52 }
 0x666   :  { %992 = vrot.lane.b32.xlu1 %v991_v12, %s3630_s0  ;;  %994 = vrot.lane.b32.xlu0 %v991_v12, %s3614_s21 }
 0x66a   :  { %996 = vrot.lane.b32.xlu1 %v991_v12, %s3629_s12 }
 0x688   :  { %v1078_v20 = vpop.f32.mrb[12].mxu1 }
 0x689   :  { %v2979_v53 = vadd.f32 %v4112_v21, %v1078_v20  ;;  %v2655_v55 = vpop.f32.mrb[13].mxu1 }
 0x68a   :  { %v1081_v4 = vpop.f32.mrb[14].mxu1 }
 0x68b   :  { %v2180_v14 = vmul.f32 -1.442695, %v2979_v53  ;;  %v2656_v19 = vpop.f32.mrb[15].mxu1 }
 0x68d   :  { %3132 = vpow2.f32 %v2180_v14 }
 0x68e   :  { %3134 = vtanh.f32 %v2979_v53 }
 0x697   :  { %v3133_v23 = vpop.eup %3132 }
 0x698   :  { %v1089_v50 = vadd.f32 1.0, %v3133_v23  ;;  %v3135_v24 = vpop.eup %3134 }
 0x69a   :  { %3136 = vrcp.f32 %v1089_v50 }
 0x6a4   :  { %v3137_v25 = vpop.eup %3136 }
 0x6a5   :  { %v1092_v26 = vsel %vm4002_vm5, %v3135_v24, %v3137_v25 }
 0x6a6   :  { %1095 = vrot.lane.b32.xlu1 %v1092_v26, %s3614_s21  ;;  %1093 = vrot.lane.b32.xlu0 %v1092_v26, %s3630_s0 }
 0x6aa   :  { %1097 = vrot.lane.b32.xlu0 %v1092_v26, %s3629_s12 }
 0x6d8   :  { %v993_v27 = vpop.permute.xlu1 %992  ;;  %v995_v29 = vpop.permute.xlu0 %994 }
 0x6d9   :  { %v998_v30 = vmul.f32 %v993_v27, %v4196_v31  ;;  %v999_v32 = vmul.f32 %v995_v29, %v991_v12 }
 0x6db   :  { %v4271_v34 = vadd.f32 %v999_v32, %v998_v30 }
 0x6dc   :  { %v997_v38 = vpop.permute.xlu1 %996 }
 0x6dd   :  { %3138 = vtanh.f32 %v4271_v34 }
 0x6e7   :  { %v3139_v36 = vpop.eup %3138 }
 0x6e8   :  { %v1002_v63 = vmul.f32 %v3139_v36, %v997_v38 }
 0x6ea   :  { %v1003_v40 = vpack.c.bf16 %v1002_v63, %v1002_v63 }
 0x6ec   :  { %2674 = vmatmul.mubr.bf16.vlgmr.msra.gmra.mrb[20].mxu0 %v1003_v40 }
 0x6ed   :  { %2678 = vmatpush3.bf16.msra.mxu0 %v3971_v15  ;;  %2693 = vmatprep.mubr.msk.bf16.mxu0 %vm3628_vm0, %v3627_v0 }
 0x6ee   :  { %2679 = vmatprep.subr.bf16.mxu0 %v3627_v0 }
 0x6f1   :  { %2680 = vmatpush3.bf16.msra.mxu0 %v3974_v16 }
 0x6f2   :  { %2681 = vmatprep.subr.bf16.mxu0 %v3627_v0 }
 0x6f5   :  { %2682 = vmatpush3.bf16.msra.mxu0 %v3978_v17 }
 0x6f6   :  { %2683 = vmatprep.subr.bf16.mxu0 %v3627_v0 }
 0x6f9   :  { %2684 = vmatpush3.bf16.msra.mxu0 %v3992_v33 }
 0x6fa   :  { %2685 = vmatprep.subr.bf16.mxu0 %v3627_v0 }
 0x6fd   :  { %2686 = vmatpush3.bf16.msra.mxu0 %v3996_v35 }
 0x6fe   :  { %2687 = vmatprep.subr.bf16.mxu0 %v3627_v0 }
 0x701   :  { %2688 = vmatpush3.bf16.msra.mxu0 %v4000_v37 }
 0x702   :  { %2689 = vmatprep.subr.bf16.mxu0 %v3627_v0 }
 0x705   :  { %2690 = vmatpush3.bf16.msra.mxu0 %v4009_v42 }
 0x706   :  { %2691 = vmatprep.subr.bf16.mxu0 %v3627_v0 }
 0x709   :  { %2692 = vmatpush3.bf16.msra.mxu0 %v4019_v44 }
 0x70a   :  { %2697 = vmatprep.subr.bf16.mxu0 %v3627_v0 }
 0x70c   :  { %2694 = vmatmul.mubr.bf16.vlgmr.msra.gmra.mrb[24].mxu0 %v1003_v40 }
 0x70d   :  { %2698 = vmatpush3.bf16.msra.mxu0 %v4028_v54  ;;  %2713 = vmatprep.mubr.msk.bf16.mxu0 %vm3628_vm0, %v3627_v0 }
 0x70e   :  { %2699 = vmatprep.subr.bf16.mxu0 %v3627_v0 }
 0x711   :  { %2700 = vmatpush3.bf16.msra.mxu0 %v4031_v56 }
 0x712   :  { %2701 = vmatprep.subr.bf16.mxu0 %v3627_v0 }
 0x715   :  { %2702 = vmatpush3.bf16.msra.mxu0 %v4041_v57 }
 0x716   :  { %2703 = vmatprep.subr.bf16.mxu0 %v3627_v0 }
 0x718   :  { %v1096_v15 = vpop.permute.xlu1 %1095  ;;  %v1094_v16 = vpop.permute.xlu0 %1093 }
 0x719   :  { %v1100_v17 = vmul.f32 %v1096_v15, %v1092_v26  ;;  %v1099_v31 = vmul.f32 %v1094_v16, %v4228_v45  ;;  %2704 = vmatpush3.bf16.msra.mxu0 %v4047_v58 }
 0x71a   :  { %2705 = vmatprep.subr.bf16.mxu0 %v3627_v0 }
 0x71b   :  { %v4303_v41 = vadd.f32 %v1100_v17, %v1099_v31 }
 0x71c   :  { %v1098_v45 = vpop.permute.xlu0 %1097 }
 0x71d   :  { %3140 = vtanh.f32 %v4303_v41  ;;  %2706 = vmatpush3.bf16.msra.mxu0 %v4053_v59 }
 0x71e   :  { %2707 = vmatprep.subr.bf16.mxu0 %v3627_v0 }
 0x721   :  { %2708 = vmatpush3.bf16.msra.mxu0 %v4059_v60 }
 0x722   :  { %2709 = vmatprep.subr.bf16.mxu0 %v3627_v0 }
 0x725   :  { %2710 = vmatpush3.bf16.msra.mxu0 %v4065_v61 }
 0x726   :  { %2711 = vmatprep.subr.bf16.mxu0 %v3627_v0 }
 0x727   :  { %v3141_v43 = vpop.eup %3140 }
 0x728   :  { %v1103_v28 = vmul.f32 %v3141_v43, %v1098_v45  ;;  %v4365_v45 = vld [vmem:[#allocation11] sm:$0xff]  }
 0x729   :  { %2712 = vmatpush3.bf16.msra.mxu0 %v4071_v62 }
 0x72a   :  { %v1104_v46 = vpack.c.bf16 %v1103_v28, %v1103_v28  ;;  %2777 = vmatprep.subr.bf16.mxu0 %v3627_v0  ;;  %v4371_v28 = vld [vmem:[#allocation11 + $0x8] sm:$0xff]  }
 0x72c   :  { %2714 = vmatmul.mubr.bf16.vlgmr.msra.gmra.mrb[24].mxu0 %v1104_v46 }
 0x72d   :  { %2778 = vmatpush3.bf16.msra.mxu0 %v4314_v47  ;;  %2793 = vmatprep.mubr.msk.bf16.mxu0 %vm3628_vm0, %v3627_v0 }
 0x72e   :  { %2779 = vmatprep.subr.bf16.mxu0 %v3627_v0 }
 0x731   :  { %2780 = vmatpush3.bf16.msra.mxu0 %v4320_v48 }
 0x732   :  { %2781 = vmatprep.subr.bf16.mxu0 %v3627_v0 }
 0x735   :  { %2782 = vmatpush3.bf16.msra.mxu0 %v4324_v1 }
 0x736   :  { %2783 = vmatprep.subr.bf16.mxu0 %v3627_v0 }
 0x739   :  { %2784 = vmatpush3.bf16.msra.mxu0 %v4328_v2 }
 0x73a   :  { %2785 = vmatprep.subr.bf16.mxu0 %v3627_v0 }
 0x73d   :  { %2786 = vmatpush3.bf16.msra.mxu0 %v4332_v3 }
 0x73e   :  { %2787 = vmatprep.subr.bf16.mxu0 %v3627_v0 }
 0x741   :  { %2788 = vmatpush3.bf16.msra.mxu0 %v4336_v8 }
 0x742   :  { %2789 = vmatprep.subr.bf16.mxu0 %v3627_v0 }
 0x745   :  { %2790 = vmatpush3.bf16.msra.mxu0 %v4340_v9 }
 0x746   :  { %2791 = vmatprep.subr.bf16.mxu0 %v3627_v0 }
 0x749   :  { %2792 = vmatpush3.bf16.msra.mxu0 %v4344_v49 }
 0x74a   :  { %2797 = vmatprep.subr.bf16.mxu0 %v3627_v0 }
 0x7bf   :  { %v1140_v10 = vpop.f32.mrb[20].mxu0 }
 0x7c0   :  { %v1146_v18 = vadd.f32 %v1140_v10, %v320_v51  ;;  %v2675_v11 = vpop.f32.mrb[21].mxu0 }
 0x7c1   :  { %v1143_v52 = vpop.f32.mrb[22].mxu0 }
 0x7c2   :  { %v2181_v12 = vmul.f32 -1.442695, %v1146_v18  ;;  %v2676_v20 = vpop.f32.mrb[23].mxu0 }
 0x7c4   :  { %3142 = vpow2.f32 %v2181_v12 }
 0x7c5   :  { %3144 = vtanh.f32 %v1146_v18 }
 0x7ce   :  { %v3143_v53 = vpop.eup %3142 }
 0x7cf   :  { %v1151_v55 = vadd.f32 1.0, %v3143_v53  ;;  %v3145_v4 = vpop.eup %3144 }
 0x7d1   :  { %3146 = vrcp.f32 %v1151_v55 }
 0x7db   :  { %v3147_v14 = vpop.eup %3146 }
 0x7dc   :  { %v1154_v19 = vsel %vm4002_vm5, %v3145_v4, %v3147_v14 }
 0x7dd   :  { %1157 = vrot.lane.b32.xlu0 %v1154_v19, %s3614_s21  ;;  %1155 = vrot.lane.b32.xlu1 %v1154_v19, %s3630_s0 }
 0x7e1   :  { %1159 = vrot.lane.b32.xlu1 %v1154_v19, %s3629_s12 }
 0x7ff   :  { %v1241_v22 = vpop.f32.mrb[24].mxu0 }
 0x800   :  { %v2980_v6 = vadd.f32 %v4112_v21, %v1241_v22  ;;  %v2715_v23 = vpop.f32.mrb[25].mxu0 }
 0x801   :  { %v1244_v50 = vpop.f32.mrb[26].mxu0 }
 0x802   :  { %v2182_v24 = vmul.f32 -1.442695, %v2980_v6  ;;  %v2716_v25 = vpop.f32.mrb[27].mxu0 }
 0x803   :  { %v4456_v25 = vld [vmem:[#allocation11 + $0x18] sm:$0xff]  }
 0x804   :  { %3148 = vpow2.f32 %v2182_v24 }
 0x805   :  { %3150 = vtanh.f32 %v2980_v6 }
 0x80e   :  { %v3149_v26 = vpop.eup %3148 }
 0x80f   :  { %v1252_v27 = vadd.f32 1.0, %v3149_v26  ;;  %v3151_v29 = vpop.eup %3150  ;;  %v4460_v26 = vld [vmem:[#allocation11 + $0x20] sm:$0xff]  }
 0x811   :  { %3152 = vrcp.f32 %v1252_v27  ;;  %v4464_v27 = vld [vmem:[#allocation11 + $0x28] sm:$0xff]  }
 0x81b   :  { %v3153_v30 = vpop.eup %3152 }
 0x81c   :  { %v1255_v32 = vsel %vm4002_vm5, %v3151_v29, %v3153_v30  ;;  %v4468_v29 = vld [vmem:[#allocation11 + $0x30] sm:$0xff]   ;;  %v4472_v30 = vld [vmem:[#allocation11 + $0x38] sm:$0xff]  }
 0x81d   :  { %1258 = vrot.lane.b32.xlu1 %v1255_v32, %s3614_s21  ;;  %1256 = vrot.lane.b32.xlu0 %v1255_v32, %s3630_s0 }
 0x821   :  { %1260 = vrot.lane.b32.xlu0 %v1255_v32, %s3629_s12 }
 0x84f   :  { %v1158_v36 = vpop.permute.xlu0 %1157  ;;  %v1156_v38 = vpop.permute.xlu1 %1155 }
 0x850   :  { %v1162_v63 = vmul.f32 %v1158_v36, %v1154_v19  ;;  %v1161_v40 = vmul.f32 %v1156_v38, %v4271_v34  ;;  %v4375_v34 = vld [vmem:[#allocation11 + $0x10] sm:$0xff]   ;;  %v4482_v36 = vld [vmem:[#allocation12 + $0x8] sm:$0xff]  }
 0x851   :  { %v4486_v38 = vld [vmem:[#allocation12 + $0x10] sm:$0xff]  }
 0x852   :  { %v4362_v15 = vadd.f32 %v1162_v63, %v1161_v40 }
 0x853   :  { %v1160_v17 = vpop.permute.xlu1 %1159 }
 0x854   :  { %3154 = vtanh.f32 %v4362_v15 }
 0x85e   :  { %v3155_v16 = vpop.eup %3154 }
 0x85f   :  { %v1165_v31 = vmul.f32 %v3155_v16, %v1160_v17  ;;  %v4491_v17 = vld [vmem:[#allocation12 + $0x18] sm:$0xff]  }
 0x861   :  { %v1166_v43 = vpack.c.bf16 %v1165_v31, %v1165_v31 }
 0x863   :  { %2734 = vmatmul.mubr.bf16.vlgmr.msra.gmra.mrb[16].mxu1 %v1166_v43 }
 0x864   :  { %2738 = vmatpush3.bf16.msra.mxu1 %v4365_v45  ;;  %2753 = vmatprep.mubr.msk.bf16.mxu1 %vm3628_vm0, %v3627_v0 }
 0x865   :  { %2739 = vmatprep.subr.bf16.mxu1 %v3627_v0 }
 0x868   :  { %2740 = vmatpush3.bf16.msra.mxu1 %v4371_v28 }
 0x869   :  { %2741 = vmatprep.subr.bf16.mxu1 %v3627_v0 }
 0x86c   :  { %2742 = vmatpush3.bf16.msra.mxu1 %v4375_v34 }
 0x86d   :  { %2743 = vmatprep.subr.bf16.mxu1 %v3627_v0 }
 0x870   :  { %2744 = vmatpush3.bf16.msra.mxu1 %v3992_v33 }
 0x871   :  { %2745 = vmatprep.subr.bf16.mxu1 %v3627_v0 }
 0x874   :  { %2746 = vmatpush3.bf16.msra.mxu1 %v3996_v35 }
 0x875   :  { %2747 = vmatprep.subr.bf16.mxu1 %v3627_v0 }
 0x878   :  { %2748 = vmatpush3.bf16.msra.mxu1 %v4000_v37 }
 0x879   :  { %2749 = vmatprep.subr.bf16.mxu1 %v3627_v0 }
 0x87c   :  { %2750 = vmatpush3.bf16.msra.mxu1 %v4009_v42 }
 0x87d   :  { %2751 = vmatprep.subr.bf16.mxu1 %v3627_v0 }
 0x880   :  { %2752 = vmatpush3.bf16.msra.mxu1 %v4019_v44 }
 0x881   :  { %2757 = vmatprep.subr.bf16.mxu1 %v3627_v0 }
 0x883   :  { %2754 = vmatmul.mubr.bf16.vlgmr.msra.gmra.mrb[20].mxu1 %v1166_v43  ;;  %v4498_v43 = vld [vmem:[#allocation12 + $0x20] sm:$0xff]  }
 0x884   :  { %2758 = vmatpush3.bf16.msra.mxu1 %v4028_v54  ;;  %2773 = vmatprep.mubr.msk.bf16.mxu1 %vm3628_vm0, %v3627_v0 }
 0x885   :  { %2759 = vmatprep.subr.bf16.mxu1 %v3627_v0 }
 0x888   :  { %2760 = vmatpush3.bf16.msra.mxu1 %v4031_v56 }
 0x889   :  { %2761 = vmatprep.subr.bf16.mxu1 %v3627_v0 }
 0x88c   :  { %2762 = vmatpush3.bf16.msra.mxu1 %v4041_v57 }
 0x88d   :  { %2763 = vmatprep.subr.bf16.mxu1 %v3627_v0 }
 0x88f   :  { %v1259_v33 = vpop.permute.xlu1 %1258  ;;  %v1257_v35 = vpop.permute.xlu0 %1256 }
 0x890   :  { %v1263_v37 = vmul.f32 %v1259_v33, %v1255_v32  ;;  %v1262_v42 = vmul.f32 %v1257_v35, %v4303_v41  ;;  %2764 = vmatpush3.bf16.msra.mxu1 %v4047_v58  ;;  %v4476_v32 = vld [vmem:[#allocation12] sm:$0xff]   ;;  %v4502_v33 = vld [vmem:[#allocation12 + $0x28] sm:$0xff]   ;;  %v4506_v35 = vld [vmem:[#allocation12 + $0x30] sm:$0xff]  }
 0x891   :  { %2765 = vmatprep.subr.bf16.mxu1 %v3627_v0 }
 0x892   :  { %v4400_v44 = vadd.f32 %v1263_v37, %v1262_v42 }
 0x893   :  { %v1261_v56 = vpop.permute.xlu0 %1260 }
 0x894   :  { %3156 = vtanh.f32 %v4400_v44  ;;  %2766 = vmatpush3.bf16.msra.mxu1 %v4053_v59  ;;  %v4429_v59 = vld [vmem:[#allocation9] ss:$0 sm:$0xff] }
 0x895   :  { %2767 = vmatprep.subr.bf16.mxu1 %v3627_v0 }
 0x898   :  { %2768 = vmatpush3.bf16.msra.mxu1 %v4059_v60  ;;  %v323_v60 = vadd.f32 %v4429_v59, %v4104_v13 }
 0x899   :  { %2769 = vmatprep.subr.bf16.mxu1 %v3627_v0 }
 0x89c   :  { %2770 = vmatpush3.bf16.msra.mxu1 %v4065_v61 }
 0x89d   :  { %2771 = vmatprep.subr.bf16.mxu1 %v3627_v0 }
 0x89e   :  { %v3157_v54 = vpop.eup %3156 }
 0x89f   :  { %v1266_v57 = vmul.f32 %v3157_v54, %v1261_v56  ;;  %v4510_v54 = vld [vmem:[#allocation12 + $0x38] sm:$0xff]  }
 0x8a0   :  { %2772 = vmatpush3.bf16.msra.mxu1 %v4071_v62 }
 0x8a1   :  { %v1267_v58 = vpack.c.bf16 %v1266_v57, %v1266_v57  ;;  %2837 = vmatprep.subr.bf16.mxu1 %v3627_v0  ;;  %v328_v57 = vadd.f32 %v4429_v59, %v4098_v5 }
 0x8a3   :  { %2774 = vmatmul.mubr.bf16.vlgmr.msra.gmra.mrb[20].mxu1 %v1267_v58 }
 0x8a4   :  { %2838 = vmatpush3.bf16.msra.mxu1 %v4314_v47  ;;  %2853 = vmatprep.mubr.msk.bf16.mxu1 %vm3628_vm0, %v3627_v0 }
 0x8a5   :  { %2839 = vmatprep.subr.bf16.mxu1 %v3627_v0 }
 0x8a8   :  { %2840 = vmatpush3.bf16.msra.mxu1 %v4320_v48 }
 0x8a9   :  { %2841 = vmatprep.subr.bf16.mxu1 %v3627_v0 }
 0x8ac   :  { %2842 = vmatpush3.bf16.msra.mxu1 %v4324_v1 }
 0x8ad   :  { %2843 = vmatprep.subr.bf16.mxu1 %v3627_v0 }
 0x8b0   :  { %2844 = vmatpush3.bf16.msra.mxu1 %v4328_v2 }
 0x8b1   :  { %2845 = vmatprep.subr.bf16.mxu1 %v3627_v0 }
 0x8b4   :  { %2846 = vmatpush3.bf16.msra.mxu1 %v4332_v3 }
 0x8b5   :  { %2847 = vmatprep.subr.bf16.mxu1 %v3627_v0 }
 0x8b8   :  { %2848 = vmatpush3.bf16.msra.mxu1 %v4336_v8 }
 0x8b9   :  { %2849 = vmatprep.subr.bf16.mxu1 %v3627_v0 }
 0x8bc   :  { %2850 = vmatpush3.bf16.msra.mxu1 %v4340_v9 }
 0x8bd   :  { %2851 = vmatprep.subr.bf16.mxu1 %v3627_v0 }
 0x8c0   :  { %2852 = vmatpush3.bf16.msra.mxu1 %v4344_v49 }
 0x8c1   :  { %2857 = vmatprep.subr.bf16.mxu1 %v3627_v0 }
 0x936   :  { %v1303_v61 = vpop.f32.mrb[16].mxu1 }
 0x937   :  { %v1309_v62 = vadd.f32 %v1303_v61, %v323_v60  ;;  %v2735_v41 = vpop.f32.mrb[17].mxu1 }
 0x938   :  { %v1306_v46 = vpop.f32.mrb[18].mxu1 }
 0x939   :  { %v2183_v47 = vmul.f32 -1.442695, %v1309_v62  ;;  %v2736_v48 = vpop.f32.mrb[19].mxu1 }
 0x93b   :  { %3158 = vpow2.f32 %v2183_v47 }
 0x93c   :  { %3160 = vtanh.f32 %v1309_v62 }
 0x945   :  { %v3159_v1 = vpop.eup %3158 }
 0x946   :  { %v1314_v2 = vadd.f32 1.0, %v3159_v1  ;;  %v3161_v3 = vpop.eup %3160 }
 0x948   :  { %3162 = vrcp.f32 %v1314_v2 }
 0x952   :  { %v3163_v8 = vpop.eup %3162 }
 0x953   :  { %v1317_v9 = vsel %vm4002_vm5, %v3161_v3, %v3163_v8  ;;  %v4539_v8 = vld [vmem:[#allocation14] ss:$0 sm:$0xff] }
 0x954   :  { %1318 = vrot.lane.b32.xlu1 %v1317_v9, %s3630_s0  ;;  %1320 = vrot.lane.b32.xlu0 %v1317_v9, %s3614_s21 }
 0x958   :  { %1322 = vrot.lane.b32.xlu1 %v1317_v9, %s3629_s12 }
 0x976   :  { %v1404_v13 = vpop.f32.mrb[20].mxu1 }
 0x977   :  { %v2981_v49 = vadd.f32 %v4112_v21, %v1404_v13  ;;  %v2775_v51 = vpop.f32.mrb[21].mxu1 }
 0x978   :  { %v1407_v10 = vpop.f32.mrb[22].mxu1 }
 0x979   :  { %v2184_v18 = vmul.f32 -1.442695, %v2981_v49  ;;  %v2776_v11 = vpop.f32.mrb[23].mxu1 }
 0x97b   :  { %3164 = vpow2.f32 %v2184_v18 }
 0x97c   :  { %3166 = vtanh.f32 %v2981_v49 }
 0x985   :  { %v3165_v52 = vpop.eup %3164 }
 0x986   :  { %v1415_v12 = vadd.f32 1.0, %v3165_v52  ;;  %v3167_v20 = vpop.eup %3166 }
 0x988   :  { %3168 = vrcp.f32 %v1415_v12 }
 0x992   :  { %v3169_v53 = vpop.eup %3168 }
 0x993   :  { %v1418_v55 = vsel %vm4002_vm5, %v3167_v20, %v3169_v53 }
 0x994   :  { %1421 = vrot.lane.b32.xlu1 %v1418_v55, %s3614_s21  ;;  %1419 = vrot.lane.b32.xlu0 %v1418_v55, %s3630_s0 }
 0x998   :  { %1423 = vrot.lane.b32.xlu0 %v1418_v55, %s3629_s12 }
 0x9c6   :  { %v1319_v21 = vpop.permute.xlu1 %1318  ;;  %v1321_v4 = vpop.permute.xlu0 %1320 }
 0x9c7   :  { %v1324_v14 = vmul.f32 %v1319_v21, %v4362_v15  ;;  %v1325_v19 = vmul.f32 %v1321_v4, %v1317_v9 }
 0x9c9   :  { %v4445_v22 = vadd.f32 %v1325_v19, %v1324_v14 }
 0x9ca   :  { %v1323_v23 = vpop.permute.xlu1 %1322 }
 0x9cb   :  { %3170 = vtanh.f32 %v4445_v22 }
 0x9d5   :  { %v3171_v6 = vpop.eup %3170 }
 0x9d6   :  { %v1328_v50 = vmul.f32 %v3171_v6, %v1323_v23 }
 0x9d8   :  { %v1329_v24 = vpack.c.bf16 %v1328_v50, %v1328_v50 }
 0x9da   :  { %2794 = vmatmul.mubr.bf16.vlgmr.msra.gmra.mrb[28].mxu0 %v1329_v24 }
 0x9db   :  { %2798 = vmatpush3.bf16.msra.mxu0 %v4365_v45  ;;  %2813 = vmatprep.mubr.msk.bf16.mxu0 %vm3628_vm0, %v3627_v0 }
 0x9dc   :  { %2799 = vmatprep.subr.bf16.mxu0 %v3627_v0 }
 0x9df   :  { %2800 = vmatpush3.bf16.msra.mxu0 %v4371_v28 }
 0x9e0   :  { %2801 = vmatprep.subr.bf16.mxu0 %v3627_v0 }
 0x9e3   :  { %2802 = vmatpush3.bf16.msra.mxu0 %v4375_v34 }
 0x9e4   :  { %2803 = vmatprep.subr.bf16.mxu0 %v3627_v0 }
 0x9e7   :  { %2804 = vmatpush3.bf16.msra.mxu0 %v4456_v25 }
 0x9e8   :  { %2805 = vmatprep.subr.bf16.mxu0 %v3627_v0 }
 0x9eb   :  { %2806 = vmatpush3.bf16.msra.mxu0 %v4460_v26 }
 0x9ec   :  { %2807 = vmatprep.subr.bf16.mxu0 %v3627_v0 }
 0x9ef   :  { %2808 = vmatpush3.bf16.msra.mxu0 %v4464_v27 }
 0x9f0   :  { %2809 = vmatprep.subr.bf16.mxu0 %v3627_v0 }
 0x9f3   :  { %2810 = vmatpush3.bf16.msra.mxu0 %v4468_v29 }
 0x9f4   :  { %2811 = vmatprep.subr.bf16.mxu0 %v3627_v0 }
 0x9f7   :  { %2812 = vmatpush3.bf16.msra.mxu0 %v4472_v30 }
 0x9f8   :  { %2817 = vmatprep.subr.bf16.mxu0 %v3627_v0 }
 0x9fa   :  { %2814 = vmatmul.mubr.bf16.vlgmr.msra.gmra.mrb[32].mxu0 %v1329_v24 }
 0x9fb   :  { %2818 = vmatpush3.bf16.msra.mxu0 %v4476_v32  ;;  %2833 = vmatprep.mubr.msk.bf16.mxu0 %vm3628_vm0, %v3627_v0 }
 0x9fc   :  { %2819 = vmatprep.subr.bf16.mxu0 %v3627_v0 }
 0x9ff   :  { %2820 = vmatpush3.bf16.msra.mxu0 %v4482_v36 }
 0xa00   :  { %2821 = vmatprep.subr.bf16.mxu0 %v3627_v0 }
 0xa03   :  { %2822 = vmatpush3.bf16.msra.mxu0 %v4486_v38 }
 0xa04   :  { %2823 = vmatprep.subr.bf16.mxu0 %v3627_v0 }
 0xa06   :  { %v1422_v63 = vpop.permute.xlu1 %1421  ;;  %v1420_v40 = vpop.permute.xlu0 %1419 }
 0xa07   :  { %v1426_v15 = vmul.f32 %v1422_v63, %v1418_v55  ;;  %v1425_v16 = vmul.f32 %v1420_v40, %v4400_v44  ;;  %2824 = vmatpush3.bf16.msra.mxu0 %v4491_v17 }
 0xa08   :  { %2825 = vmatprep.subr.bf16.mxu0 %v3627_v0 }
 0xa09   :  { %v4495_v31 = vadd.f32 %v1426_v15, %v1425_v16 }
 0xa0a   :  { %v1424_v42 = vpop.permute.xlu0 %1423 }
 0xa0b   :  { %3172 = vtanh.f32 %v4495_v31  ;;  %2826 = vmatpush3.bf16.msra.mxu0 %v4498_v43 }
 0xa0c   :  { %2827 = vmatprep.subr.bf16.mxu0 %v3627_v0 }
 0xa0f   :  { %2828 = vmatpush3.bf16.msra.mxu0 %v4502_v33 }
 0xa10   :  { %2829 = vmatprep.subr.bf16.mxu0 %v3627_v0 }
 0xa13   :  { %2830 = vmatpush3.bf16.msra.mxu0 %v4506_v35 }
 0xa14   :  { %2831 = vmatprep.subr.bf16.mxu0 %v3627_v0 }
 0xa15   :  { %v3173_v37 = vpop.eup %3172 }
 0xa16   :  { %v1429_v44 = vmul.f32 %v3173_v37, %v1424_v42 }
 0xa17   :  { %2832 = vmatpush3.bf16.msra.mxu0 %v4510_v54 }
 0xa18   :  { %v1430_v56 = vpack.c.bf16 %v1429_v44, %v1429_v44  ;;  %2897 = vmatprep.subr.bf16.mxu0 %v3627_v0 }
 0xa1a   :  { %2834 = vmatmul.mubr.bf16.vlgmr.msra.gmra.mrb[32].mxu0 %v1430_v56 }
 0xa1b   :  { %2898 = vmatpush3.bf16.msra.mxu0 %v4365_v45  ;;  %2913 = vmatprep.mubr.msk.bf16.mxu0 %vm3628_vm0, %v3627_v0 }
 0xa1c   :  { %2899 = vmatprep.subr.bf16.mxu0 %v3627_v0 }
 0xa1f   :  { %2900 = vmatpush3.bf16.msra.mxu0 %v4371_v28 }
 0xa20   :  { %2901 = vmatprep.subr.bf16.mxu0 %v3627_v0 }
 0xa23   :  { %2902 = vmatpush3.bf16.msra.mxu0 %v4375_v34 }
 0xa24   :  { %2903 = vmatprep.subr.bf16.mxu0 %v3627_v0 }
 0xa27   :  { %2904 = vmatpush3.bf16.msra.mxu0 %v4456_v25 }
 0xa28   :  { %2905 = vmatprep.subr.bf16.mxu0 %v3627_v0 }
 0xa2b   :  { %2906 = vmatpush3.bf16.msra.mxu0 %v4460_v26 }
 0xa2c   :  { %2907 = vmatprep.subr.bf16.mxu0 %v3627_v0 }
 0xa2f   :  { %2908 = vmatpush3.bf16.msra.mxu0 %v4464_v27 }
 0xa30   :  { %2909 = vmatprep.subr.bf16.mxu0 %v3627_v0 }
 0xa33   :  { %2910 = vmatpush3.bf16.msra.mxu0 %v4468_v29 }
 0xa34   :  { %2911 = vmatprep.subr.bf16.mxu0 %v3627_v0 }
 0xa37   :  { %2912 = vmatpush3.bf16.msra.mxu0 %v4472_v30 }
 0xa38   :  { %2917 = vmatprep.subr.bf16.mxu0 %v3627_v0 }
 0xaad   :  { %v1466_v58 = vpop.f32.mrb[28].mxu0 }
 0xaae   :  { %v1472_v60 = vadd.f32 %v1466_v58, %v328_v57  ;;  %v2795_v61 = vpop.f32.mrb[29].mxu0 }
 0xaaf   :  { %v1469_v62 = vpop.f32.mrb[30].mxu0 }
 0xab0   :  { %v2185_v41 = vmul.f32 -1.442695, %v1472_v60  ;;  %v2796_v46 = vpop.f32.mrb[31].mxu0 }
 0xab2   :  { %3174 = vpow2.f32 %v2185_v41 }
 0xab3   :  { %3176 = vtanh.f32 %v1472_v60 }
 0xabc   :  { %v3175_v47 = vpop.eup %3174 }
 0xabd   :  { %v1477_v48 = vadd.f32 1.0, %v3175_v47  ;;  %v3177_v1 = vpop.eup %3176 }
 0xabf   :  { %3178 = vrcp.f32 %v1477_v48 }
 0xac9   :  { %v3179_v2 = vpop.eup %3178 }
 0xaca   :  { %v1480_v3 = vsel %vm4002_vm5, %v3177_v1, %v3179_v2 }
 0xacb   :  { %1483 = vrot.lane.b32.xlu0 %v1480_v3, %s3614_s21  ;;  %1481 = vrot.lane.b32.xlu1 %v1480_v3, %s3630_s0 }
 0xacf   :  { %1485 = vrot.lane.b32.xlu1 %v1480_v3, %s3629_s12 }
 0xaed   :  { %v1567_v5 = vpop.f32.mrb[32].mxu0 }
 0xaee   :  { %v2982_v9 = vadd.f32 %v4539_v8, %v1567_v5  ;;  %v2835_v13 = vpop.f32.mrb[33].mxu0 }
 0xaef   :  { %v1570_v49 = vpop.f32.mrb[34].mxu0 }
 0xaf0   :  { %v2186_v51 = vmul.f32 -1.442695, %v2982_v9  ;;  %v2836_v10 = vpop.f32.mrb[35].mxu0 }
 0xaf2   :  { %3180 = vpow2.f32 %v2186_v51 }
 0xaf3   :  { %3182 = vtanh.f32 %v2982_v9 }
 0xafc   :  { %v3181_v18 = vpop.eup %3180 }
 0xafd   :  { %v1578_v11 = vadd.f32 1.0, %v3181_v18  ;;  %v3183_v52 = vpop.eup %3182 }
 0xaff   :  { %3184 = vrcp.f32 %v1578_v11 }
 0xb09   :  { %v3185_v12 = vpop.eup %3184 }
 0xb0a   :  { %v1581_v20 = vsel %vm4002_vm5, %v3183_v52, %v3185_v12 }
 0xb0b   :  { %1584 = vrot.lane.b32.xlu1 %v1581_v20, %s3614_s21  ;;  %1582 = vrot.lane.b32.xlu0 %v1581_v20, %s3630_s0 }
 0xb0f   :  { %1586 = vrot.lane.b32.xlu0 %v1581_v20, %s3629_s12 }
 0xb3d   :  { %v1484_v53 = vpop.permute.xlu0 %1483  ;;  %v1482_v55 = vpop.permute.xlu1 %1481 }
 0xb3e   :  { %v1488_v21 = vmul.f32 %v1484_v53, %v1480_v3  ;;  %v1487_v4 = vmul.f32 %v1482_v55, %v4445_v22  ;;  %v3072_v53 = vld [vmem:[#allocation15 + $0x10] sm:$0xff]  }
 0xb40   :  { %v4548_v14 = vadd.f32 %v1488_v21, %v1487_v4 }
 0xb41   :  { %v1486_v6 = vpop.permute.xlu1 %1485 }
 0xb42   :  { %3186 = vtanh.f32 %v4548_v14 }
 0xb4c   :  { %v3187_v19 = vpop.eup %3186 }
 0xb4d   :  { %v1491_v23 = vmul.f32 %v3187_v19, %v1486_v6 }
 0xb4f   :  { %v1492_v50 = vpack.c.bf16 %v1491_v23, %v1491_v23 }
 0xb51   :  { %2854 = vmatmul.mubr.bf16.vlgmr.msra.gmra.mrb[24].mxu1 %v1492_v50 }
 0xb52   :  { %2858 = vmatpush3.bf16.msra.mxu1 %v4365_v45  ;;  %2873 = vmatprep.mubr.msk.bf16.mxu1 %vm3628_vm0, %v3627_v0 }
 0xb53   :  { %2859 = vmatprep.subr.bf16.mxu1 %v3627_v0 }
 0xb56   :  { %2860 = vmatpush3.bf16.msra.mxu1 %v4371_v28 }
 0xb57   :  { %2861 = vmatprep.subr.bf16.mxu1 %v3627_v0 }
 0xb5a   :  { %2862 = vmatpush3.bf16.msra.mxu1 %v4375_v34 }
 0xb5b   :  { %2863 = vmatprep.subr.bf16.mxu1 %v3627_v0 }
 0xb5e   :  { %2864 = vmatpush3.bf16.msra.mxu1 %v4456_v25 }
 0xb5f   :  { %2865 = vmatprep.subr.bf16.mxu1 %v3627_v0 }
 0xb62   :  { %2866 = vmatpush3.bf16.msra.mxu1 %v4460_v26 }
 0xb63   :  { %2867 = vmatprep.subr.bf16.mxu1 %v3627_v0 }
 0xb66   :  { %2868 = vmatpush3.bf16.msra.mxu1 %v4464_v27 }
 0xb67   :  { %2869 = vmatprep.subr.bf16.mxu1 %v3627_v0 }
 0xb6a   :  { %2870 = vmatpush3.bf16.msra.mxu1 %v4468_v29 }
 0xb6b   :  { %2871 = vmatprep.subr.bf16.mxu1 %v3627_v0 }
 0xb6e   :  { %2872 = vmatpush3.bf16.msra.mxu1 %v4472_v30  ;;  %v331_v30 = vadd.f32 %v4429_v59, %v4102_v7 }
 0xb6f   :  { %2877 = vmatprep.subr.bf16.mxu1 %v3627_v0 }
 0xb71   :  { %2874 = vmatmul.mubr.bf16.vlgmr.msra.gmra.mrb[28].mxu1 %v1492_v50  ;;  %v3073_v50 = vld [vmem:[#allocation15 + $0x18] sm:$0xff]  }
 0xb72   :  { %2878 = vmatpush3.bf16.msra.mxu1 %v4476_v32  ;;  %2893 = vmatprep.mubr.msk.bf16.mxu1 %vm3628_vm0, %v3627_v0 }
 0xb73   :  { %2879 = vmatprep.subr.bf16.mxu1 %v3627_v0 }
 0xb76   :  { %2880 = vmatpush3.bf16.msra.mxu1 %v4482_v36 }
 0xb77   :  { %2881 = vmatprep.subr.bf16.mxu1 %v3627_v0 }
 0xb7a   :  { %2882 = vmatpush3.bf16.msra.mxu1 %v4486_v38 }
 0xb7b   :  { %2883 = vmatprep.subr.bf16.mxu1 %v3627_v0 }
 0xb7d   :  { %v1585_v45 = vpop.permute.xlu1 %1584  ;;  %v1583_v28 = vpop.permute.xlu0 %1582 }
 0xb7e   :  { %v1589_v34 = vmul.f32 %v1585_v45, %v1581_v20  ;;  %v1588_v22 = vmul.f32 %v1583_v28, %v4495_v31  ;;  %2884 = vmatpush3.bf16.msra.mxu1 %v4491_v17  ;;  %v3074_v28 = vld [vmem:[#allocation15 + $0x20] sm:$0xff]  }
 0xb7f   :  { %2885 = vmatprep.subr.bf16.mxu1 %v3627_v0 }
 0xb80   :  { %v4580_v24 = vadd.f32 %v1589_v34, %v1588_v22  ;;  %v3075_v34 = vld [vmem:[#allocation15 + $0x28] sm:$0xff]   ;;  %v3076_v22 = vld [vmem:[#allocation15 + $0x30] sm:$0xff]  }
 0xb81   :  { %v1587_v26 = vpop.permute.xlu0 %1586 }
 0xb82   :  { %3188 = vtanh.f32 %v4580_v24  ;;  %2886 = vmatpush3.bf16.msra.mxu1 %v4498_v43 }
 0xb83   :  { %2887 = vmatprep.subr.bf16.mxu1 %v3627_v0 }
 0xb86   :  { %2888 = vmatpush3.bf16.msra.mxu1 %v4502_v33 }
 0xb87   :  { %2889 = vmatprep.subr.bf16.mxu1 %v3627_v0 }
 0xb8a   :  { %2890 = vmatpush3.bf16.msra.mxu1 %v4506_v35 }
 0xb8b   :  { %2891 = vmatprep.subr.bf16.mxu1 %v3627_v0 }
 0xb8c   :  { %v3189_v25 = vpop.eup %3188 }
 0xb8d   :  { %v1592_v27 = vmul.f32 %v3189_v25, %v1587_v26  ;;  %v3077_v26 = vld [vmem:[#allocation15 + $0x38] sm:$0xff]  }
 0xb8e   :  { %2892 = vmatpush3.bf16.msra.mxu1 %v4510_v54 }
 0xb8f   :  { %v1593_v29 = vpack.c.bf16 %v1592_v27, %v1592_v27  ;;  %2937 = vmatprep.subr.bf16.mxu1 %v3627_v0  ;;  %v3078_v27 = vld [vmem:[#allocation18] sm:$0xff]  }
 0xb91   :  { %2894 = vmatmul.mubr.bf16.vlgmr.msra.gmra.mrb[28].mxu1 %v1593_v29  ;;  %v3079_v29 = vld [vmem:[#allocation18 + $0x8] sm:$0xff]  }
 0xb92   :  { %2953 = vmatprep.mubr.msk.bf16.mxu1 %vm3628_vm0, %v3627_v0 }
 0xc24   :  { %v1629_v63 = vpop.f32.mrb[24].mxu1 }
 0xc25   :  { %v1635_v40 = vadd.f32 %v1629_v63, %v331_v30  ;;  %v2855_v15 = vpop.f32.mrb[25].mxu1  ;;  %v3080_v30 = vld [vmem:[#allocation18 + $0x10] sm:$0xff]   ;;  %v3082_v63 = vld [vmem:[#allocation18 + $0x20] sm:$0xff]  }
 0xc26   :  { %v1632_v16 = vpop.f32.mrb[26].mxu1  ;;  %v3084_v15 = vld [vmem:[#allocation18 + $0x30] sm:$0xff]  }
 0xc27   :  { %v2187_v31 = vmul.f32 -1.442695, %v1635_v40  ;;  %v2856_v37 = vpop.f32.mrb[27].mxu1 }
 0xc29   :  { %3190 = vpow2.f32 %v2187_v31 }
 0xc2a   :  { %3192 = vtanh.f32 %v1635_v40  ;;  %v3083_v40 = vld [vmem:[#allocation18 + $0x28] sm:$0xff]  }
 0xc33   :  { %v3191_v42 = vpop.eup %3190 }
 0xc34   :  { %v1640_v44 = vadd.f32 1.0, %v3191_v42  ;;  %v3193_v56 = vpop.eup %3192 }
 0xc36   :  { %3194 = vrcp.f32 %v1640_v44 }
 0xc40   :  { %v3195_v57 = vpop.eup %3194 }
 0xc41   :  { %v1643_v58 = vsel %vm4002_vm5, %v3193_v56, %v3195_v57 }
 0xc42   :  { %1644 = vrot.lane.b32.xlu1 %v1643_v58, %s3630_s0  ;;  %1646 = vrot.lane.b32.xlu0 %v1643_v58, %s3614_s21 }
 0xc46   :  { %1648 = vrot.lane.b32.xlu1 %v1643_v58, %s3629_s12 }
 0xc64   :  { %v1730_v7 = vpop.f32.mrb[28].mxu1 }
 0xc65   :  { %v2983_v59 = vadd.f32 %v4539_v8, %v1730_v7  ;;  %v2895_v60 = vpop.f32.mrb[29].mxu1 }
 0xc66   :  { %v1733_v61 = vpop.f32.mrb[30].mxu1  ;;  %v2190_v60 = vld [vmem:[#allocation17] ss:$0 sm:$0xff] }
 0xc67   :  { %v2188_v62 = vmul.f32 -1.442695, %v2983_v59  ;;  %v2896_v41 = vpop.f32.mrb[31].mxu1 }
 0xc69   :  { %3196 = vpow2.f32 %v2188_v62 }
 0xc6a   :  { %3198 = vtanh.f32 %v2983_v59  ;;  %v3085_v59 = vld [vmem:[#allocation18 + $0x38] sm:$0xff]  }
 0xc73   :  { %v3197_v46 = vpop.eup %3196 }
 0xc74   :  { %v1741_v47 = vadd.f32 1.0, %v3197_v46  ;;  %v3199_v48 = vpop.eup %3198 }
 0xc76   :  { %3200 = vrcp.f32 %v1741_v47 }
 0xc80   :  { %v3201_v1 = vpop.eup %3200 }
 0xc81   :  { %v1744_v2 = vsel %vm4002_vm5, %v3199_v48, %v3201_v1 }
 0xc82   :  { %1747 = vrot.lane.b32.xlu1 %v1744_v2, %s3614_s21  ;;  %1745 = vrot.lane.b32.xlu0 %v1744_v2, %s3630_s0 }
 0xc86   :  { %1749 = vrot.lane.b32.xlu0 %v1744_v2, %s3629_s12 }
 0xcb4   :  { %v1645_v3 = vpop.permute.xlu1 %1644  ;;  %v1647_v5 = vpop.permute.xlu0 %1646 }
 0xcb5   :  { %v1650_v9 = vmul.f32 %v1645_v3, %v4548_v14  ;;  %v1651_v13 = vmul.f32 %v1647_v5, %v1643_v58 }
 0xcb7   :  { %v1652_v49 = vadd.f32 %v1651_v13, %v1650_v9 }
 0xcb8   :  { %v1649_v10 = vpop.permute.xlu1 %1648 }
 0xcb9   :  { %3202 = vtanh.f32 %v1652_v49  ;;  %1859 = vst [vmem:[#allocation27] sm:$0xff] %v1652_v49 }
 0xcc3   :  { %v3203_v51 = vpop.eup %3202 }
 0xcc4   :  { %v1654_v18 = vmul.f32 %v3203_v51, %v1649_v10 }
 0xcc6   :  { %v1655_v11 = vpack.c.bf16 %v1654_v18, %v1654_v18  ;;  %1858 = vst [vmem:[#allocation25] sm:$0xff] %v1654_v18 }
 0xcc8   :  { %2914 = vmatmul.mubr.bf16.vlgmr.msra.gmra.mrb[36].mxu0 %v1655_v11 }
 0xcc9   :  { %2918 = vmatpush3.bf16.msra.mxu0 %v4476_v32  ;;  %2933 = vmatprep.mubr.msk.bf16.mxu0 %vm3628_vm0, %v3627_v0 }
 0xcca   :  { %2919 = vmatprep.subr.bf16.mxu0 %v3627_v0 }
 0xccd   :  { %2920 = vmatpush3.bf16.msra.mxu0 %v4482_v36 }
 0xcce   :  { %2921 = vmatprep.subr.bf16.mxu0 %v3627_v0 }
 0xcd1   :  { %2922 = vmatpush3.bf16.msra.mxu0 %v4486_v38 }
 0xcd2   :  { %2923 = vmatprep.subr.bf16.mxu0 %v3627_v0 }
 0xcd5   :  { %2924 = vmatpush3.bf16.msra.mxu0 %v4491_v17 }
 0xcd6   :  { %2925 = vmatprep.subr.bf16.mxu0 %v3627_v0 }
 0xcd9   :  { %2926 = vmatpush3.bf16.msra.mxu0 %v4498_v43 }
 0xcda   :  { %2927 = vmatprep.subr.bf16.mxu0 %v3627_v0 }
 0xcdd   :  { %2928 = vmatpush3.bf16.msra.mxu0 %v4502_v33 }
 0xcde   :  { %2929 = vmatprep.subr.bf16.mxu0 %v3627_v0 }
 0xce1   :  { %2930 = vmatpush3.bf16.msra.mxu0 %v4506_v35  ;;  %v3070_v35 = vld [vmem:[#allocation15] sm:$0xff]  }
 0xce2   :  { %2931 = vmatprep.subr.bf16.mxu0 %v3627_v0  ;;  %2938 = vmatpush3.bf16.msra.mxu1 %v3070_v35 }
 0xce3   :  { %2939 = vmatprep.subr.bf16.mxu1 %v3627_v0 }
 0xce5   :  { %2932 = vmatpush3.bf16.msra.mxu0 %v4510_v54  ;;  %v3071_v54 = vld [vmem:[#allocation15 + $0x8] sm:$0xff]  }
 0xce6   :  { %2957 = vmatprep.subr.bf16.mxu0 %v3627_v0  ;;  %2940 = vmatpush3.bf16.msra.mxu1 %v3071_v54 }
 0xce7   :  { %2941 = vmatprep.subr.bf16.mxu1 %v3627_v0 }
 0xcea   :  { %2942 = vmatpush3.bf16.msra.mxu1 %v3072_v53 }
 0xceb   :  { %2943 = vmatprep.subr.bf16.mxu1 %v3627_v0 }
 0xcee   :  { %2944 = vmatpush3.bf16.msra.mxu1 %v3073_v50 }
 0xcef   :  { %2945 = vmatprep.subr.bf16.mxu1 %v3627_v0 }
 0xcf2   :  { %2946 = vmatpush3.bf16.msra.mxu1 %v3074_v28 }
 0xcf3   :  { %2947 = vmatprep.subr.bf16.mxu1 %v3627_v0 }
 0xcf4   :  { %v1748_v32 = vpop.permute.xlu1 %1747  ;;  %v1746_v36 = vpop.permute.xlu0 %1745 }
 0xcf5   :  { %v1752_v38 = vmul.f32 %v1748_v32, %v1744_v2  ;;  %v1751_v17 = vmul.f32 %v1746_v36, %v4580_v24 }
 0xcf6   :  { %2948 = vmatpush3.bf16.msra.mxu1 %v3075_v34 }
 0xcf7   :  { %v4626_v43 = vadd.f32 %v1752_v38, %v1751_v17  ;;  %2949 = vmatprep.subr.bf16.mxu1 %v3627_v0 }
 0xcf8   :  { %v1750_v52 = vpop.permute.xlu0 %1749 }
 0xcf9   :  { %3204 = vtanh.f32 %v4626_v43 }
 0xcfa   :  { %2950 = vmatpush3.bf16.msra.mxu1 %v3076_v22 }
 0xcfb   :  { %2951 = vmatprep.subr.bf16.mxu1 %v3627_v0 }
 0xcfe   :  { %2952 = vmatpush3.bf16.msra.mxu1 %v3077_v26 }
 0xd03   :  { %v3205_v33 = vpop.eup %3204 }
 0xd04   :  { %v1755_v12 = vmul.f32 %v3205_v33, %v1750_v52 }
 0xd06   :  { %v1756_v20 = vpack.c.bf16 %v1755_v12, %v1755_v12 }
 0xd08   :  { %2934 = vmatmul.mubr.bf16.vlgmr.msra.gmra.mrb[36].mxu0 %v1756_v20 }
 0xd09   :  { %2973 = vmatprep.mubr.msk.bf16.mxu0 %vm3628_vm0, %v3627_v0  ;;  %2958 = vmatpush3.bf16.msra.mxu0 %v3078_v27 }
 0xd0a   :  { %2959 = vmatprep.subr.bf16.mxu0 %v3627_v0 }
 0xd0d   :  { %2960 = vmatpush3.bf16.msra.mxu0 %v3079_v29 }
 0xd0e   :  { %2961 = vmatprep.subr.bf16.mxu0 %v3627_v0 }
 0xd11   :  { %2962 = vmatpush3.bf16.msra.mxu0 %v3080_v30 }
 0xd12   :  { %2963 = vmatprep.subr.bf16.mxu0 %v3627_v0 }
 0xd15   :  { %2964 = vmatpush3.bf16.msra.mxu0 %v3081_v39 }
 0xd16   :  { %2965 = vmatprep.subr.bf16.mxu0 %v3627_v0 }
 0xd19   :  { %2966 = vmatpush3.bf16.msra.mxu0 %v3082_v63 }
 0xd1a   :  { %2967 = vmatprep.subr.bf16.mxu0 %v3627_v0 }
 0xd1d   :  { %2968 = vmatpush3.bf16.msra.mxu0 %v3083_v40 }
 0xd1e   :  { %2969 = vmatprep.subr.bf16.mxu0 %v3627_v0 }
 0xd21   :  { %2970 = vmatpush3.bf16.msra.mxu0 %v3084_v15 }
 0xd22   :  { %2971 = vmatprep.subr.bf16.mxu0 %v3627_v0 }
 0xd25   :  { %2972 = vmatpush3.bf16.msra.mxu0 %v3085_v59 }
 0xddb   :  { %v1831_v55 = vpop.f32.mrb[36].mxu0 }
 0xddc   :  { %v2984_v21 = vadd.f32 %v4539_v8, %v1831_v55  ;;  %v2935_v4 = vpop.f32.mrb[37].mxu0 }
 0xddd   :  { %v1834_v14 = vpop.f32.mrb[38].mxu0 }
 0xdde   :  { %v2189_v19 = vmul.f32 -1.442695, %v2984_v21  ;;  %v2936_v6 = vpop.f32.mrb[39].mxu0 }
 0xde0   :  { %3206 = vpow2.f32 %v2189_v19 }
 0xde1   :  { %3208 = vtanh.f32 %v2984_v21 }
 0xdea   :  { %v3207_v23 = vpop.eup %3206 }
 0xdeb   :  { %v1842_v45 = vadd.f32 1.0, %v3207_v23  ;;  %v3209_v8 = vpop.eup %3208 }
 0xded   :  { %3210 = vrcp.f32 %v1842_v45 }
 0xdf7   :  { %v3211_v24 = vpop.eup %3210 }
 0xdf8   :  { %v1845_v25 = vsel %vm4002_vm5, %v3209_v8, %v3211_v24 }
 0xdf9   :  { %1848 = vrot.lane.b32.xlu0 %v1845_v25, %s3614_s21  ;;  %1846 = vrot.lane.b32.xlu1 %v1845_v25, %s3630_s0  ;;  %s3631_s21 = smov [#allocation25]  }
 0xdfa   :  { %s2103_s20 = sshll.u32 %s3631_s21, 4  ;;  %s2104_s20 = int_to_ptr.vmem [resolvable:$true] %s2103_s20 }
 0xdfb   :  { %s3526_s29 = scalar_lea.vmem %s2104_s20, 256  ;;  %p3531_p7 = scmp.lt.s32.totalorder %s2104_s20, %s2104_s20 }
 0xdfc   :  { %p3527_p6 = scmp.ne.s32.totalorder %s2104_s20, %s3526_s29  ;;  %p3532_p8 = scmp.lt.s32.totalorder %s3526_s29, %s3526_s29 }
 0xdfd   :  { %1850 = vrot.lane.b32.xlu1 %v1845_v25, %s3629_s12 }
 0xdfe   :  { %p3533_p9 = por %p3532_p8, %p3531_p7 }
 0xe00   :  { %p3534_p10 = pnand %p3533_p9, %p3527_p6 }
 0xe6b   :  { %v1849_v16 = vpop.permute.xlu0 %1848  ;;  %v1847_v31 = vpop.permute.xlu1 %1846 }
 0xe6c   :  { %v1853_v37 = vmul.f32 %v1849_v16, %v1845_v25  ;;  %v1852_v42 = vmul.f32 %v1847_v31, %v4626_v43 }
 0xe6e   :  { %v1854_v44 = vadd.f32 %v1853_v37, %v1852_v42 }
 0xe6f   :  { %v1851_v57 = vpop.permute.xlu1 %1850 }
 0xe70   :  { %3212 = vtanh.f32 %v1854_v44  ;;  %1863 = vst [vmem:[#allocation27 + $0x8] sm:$0xff] %v1854_v44 }
 0xe7a   :  { %v3213_v56 = vpop.eup %3212 }
 0xe7b   :  { %v1856_v58 = vmul.f32 %v3213_v56, %v1851_v57 }
 0xe7d   :  { %v1857_v7 = vpack.c.bf16 %v1856_v58, %v1856_v58  ;;  %1861 = vst [vmem:[#allocation25 + $0x8] sm:$0xff] %v1856_v58 }
 0xe7f   :  { %2954 = vmatmul.mubr.bf16.vlgmr.msra.gmra.mrb[32].mxu1 %v1857_v7 }
 0xf52   :  { %v1969_v61 = vpop.f32.mrb[32].mxu1 }
 0xf53   :  { %v1970_v62 = vadd.f32 %v2190_v60, %v1969_v61  ;;  %v2955_v0 = vpop.f32.mrb[33].mxu1 }
 0xf54   :  { %v1972_v41 = vpop.f32.mrb[34].mxu1 }
 0xf55   :  { %v1975_v46 = vpack.c.bf16 %v1970_v62, %v1970_v62  ;;  %v2956_v47 = vpop.f32.mrb[35].mxu1 }
 0xf57   :  { %2974 = vmatmul.mubr.bf16.vlgmr.msra.gmra.mrb[40].mxu0 %v1975_v46 }
 0xf58   :  { %3537 = shalt.err (!%p3534_p10)
}
 0xf59   :  { %s3538_s27 = scalar_lea.hbm %s4708_s14, 256 }
 0xf5a   :  { %p3539_p11 = scmp.ne.s32.totalorder %s4708_s14, %s3538_s27  ;;  %p3542_p12 = scmp.lt.u32.totalorder %s3538_s27, %s4708_s14 }
 0xf5c   :  { %p3544_p13 = pnand %p3542_p12, %p3539_p11 }
 0xf5e   :  { %3547 = shalt.err (!%p3544_p13)
}
 0xf5f   :  { %2109 = dma.vmem_to_hbm [thread:$0]  %s2104_s20, 256, %s4708_s14, [#allocation26], %s3618_s9, %s3618_s9, %s3619_s25  }
 0xf60   :  { %s3632_s17 = smov [#allocation27]  }
 0xf61   :  { %s2115_s18 = sshll.u32 %s3632_s17, 4  ;;  %s2116_s18 = int_to_ptr.vmem [resolvable:$true] %s2115_s18 }
 0xf62   :  { %s3548_s2 = scalar_lea.vmem %s2116_s18, 256  ;;  %p3553_p1 = scmp.lt.s32.totalorder %s2116_s18, %s2116_s18 }
 0xf63   :  { %p3549_p0 = scmp.ne.s32.totalorder %s2116_s18, %s3548_s2  ;;  %p3554_p2 = scmp.lt.s32.totalorder %s3548_s2, %s3548_s2 }
 0xf65   :  { %p3555_p3 = por %p3554_p2, %p3553_p1 }
 0xf67   :  { %p3556_p4 = pnand %p3555_p3, %p3549_p0 }
 0xf69   :  { %3559 = shalt.err (!%p3556_p4)
}
 0xf6a   :  { %s3560_s22 = scalar_lea.hbm %s4709_s15, 256 }
 0xf6b   :  { %p3561_p5 = scmp.ne.s32.totalorder %s4709_s15, %s3560_s22  ;;  %p3564_p6 = scmp.lt.u32.totalorder %s3560_s22, %s4709_s15 }
 0xf6d   :  { %p3566_p7 = pnand %p3564_p6, %p3561_p5 }
 0xf6f   :  { %3569 = shalt.err (!%p3566_p7)
}
 0xf70   :  { %2121 = dma.vmem_to_hbm [thread:$0]  %s2116_s18, 256, %s4709_s15, [#allocation26], %s3618_s9, %s3618_s9, %s3619_s25   ;;  %v2199_v48 = vld [vmem:[#allocation20] ss:$0 sm:$0xff] }
 0xf71   :  { %s3633_s30 = smov [#allocation24]  }
 0xf72   :  { %s2094_s12 = sshll.u32 %s3633_s30, 4  ;;  %s2095_s12 = int_to_ptr.vmem [resolvable:$true] %s2094_s12 }
 0xf73   :  { %s3570_s0 = scalar_lea.vmem %s2095_s12, 128  ;;  %p3575_p9 = scmp.lt.s32.totalorder %s2095_s12, %s2095_s12 }
 0xf74   :  { %p3571_p8 = scmp.ne.s32.totalorder %s2095_s12, %s3570_s0  ;;  %p3576_p10 = scmp.lt.s32.totalorder %s3570_s0, %s3570_s0 }
 0xf76   :  { %p3577_p11 = por %p3576_p10, %p3575_p9 }
 0xf78   :  { %p3578_p12 = pnand %p3577_p11, %p3571_p8 }
0x102a   :  { %v2081_v1 = vpop.f32.mrb[40].mxu0 }
0x102b   :  { %v2082_v2 = vadd.f32 %v2199_v48, %v2081_v1  ;;  %v2975_v3 = vpop.f32.mrb[41].mxu0 }
0x102c   :  { %v2084_v5 = vpop.f32.mrb[42].mxu0 }
0x102d   :  { %2087 = vst [vmem:[#allocation24] sm:$0xff] %v2082_v2  ;;  %v2976_v9 = vpop.f32.mrb[43].mxu0 }
0x102e   :  { %3581 = shalt.err (!%p3578_p12)
}
0x102f   :  { %s3582_s15 = scalar_lea.hbm %s4707_s13, 128 }
0x1030   :  { %p3583_p13 = scmp.ne.s32.totalorder %s4707_s13, %s3582_s15  ;;  %p3586_p0 = scmp.lt.u32.totalorder %s3582_s15, %s4707_s13 }
0x1032   :  { %p3588_p1 = pnand %p3586_p0, %p3583_p13 }
0x1034   :  { %3591 = shalt.err (!%p3588_p1)
}
0x1035   :  { %2097 = dma.vmem_to_hbm [thread:$0]  %s2095_s12, 128, %s4707_s13, [#allocation5]  }
0x1036   :  { %3606 = dma.done.wait [#allocation5], 128  }
0x1037   :  { %3607 = vsyncadd [#allocation5], 4294967168 }
0x1038   :  { %3608 = dma.done.wait [#allocation26], 512  }
0x1039   :  { %3609 = vsyncadd [#allocation26], 4294966784 }
0x103a   :  { %2131 = vsyncpa [#allocation4], 1 }
0x103b   :  { %2132 = vsyncpa [#allocation7], 1 }
0x103c   :  { %2133 = vsyncpa [#allocation10], 1 }
0x103d   :  { %2134 = vsyncpa [#allocation13], 1 }
0x103e   :  { %2135 = vsyncpa [#allocation16], 1 }
0x103f   :  { %2136 = vsyncpa [#allocation19], 1 }
0x1040   :  { %2137 = vsyncpa [#allocation22], 1 }
0x1041   :  { %2138 = vsyncpa [#allocation5], 1 }
0x1042   :  { %2139 = vsyncpa [#allocation26], 1 }

</bundles_post_ra>
